<compile_context>
chip_gen: v6e
topology: v6e:2x2x1
jax: 0.10.0
libtpu: 0.0.40
codegen_flags: <defaults>
</compile_context>

<pallas_src>
import jax
import jax.numpy as jnp
import numpy as np
from jax.experimental import pallas as pl
from jax.experimental.pallas import tpu as pltpu

# ---------------- LSTNet hyper-parameters (the `args` of the module) ----------------
B = 2              # batch_size
P = 16             # window_size
HORIZON = 2        # step_size
SKIP = 4           # skip
HW = 4             # highway_window
M_X = 4            # input_feature_num
M_Y = 2            # output_feature_num
HID_R = 32         # hid_RNN
HID_C = 16         # hid_CNN
HID_S = 8          # hidSkip
CK = 3             # CNN_kernel
PT = (P - CK) // SKIP          # 3
T = P - CK + 1                 # conv output length = 14
OUT_DIM = M_Y * HORIZON        # 4


# ------------------------------- Pallas kernel --------------------------------------
def _gru_gates(gi, gh, h, H):
    """PyTorch GRU cell update given precomputed input gates gi and hidden gates gh."""
    r = jax.nn.sigmoid(gi[:, :H] + gh[:, :H])
    z = jax.nn.sigmoid(gi[:, H:2 * H] + gh[:, H:2 * H])
    n = jnp.tanh(gi[:, 2 * H:] + r * gh[:, 2 * H:])
    return (1.0 - z) * n + z * h


def lstnet_kernel(patches_ref, z_ref, conv_w_ref, conv_b_ref,
                  g1_wih_ref, g1_whh_ref, g1_bih_ref, g1_bhh_ref,
                  gs_wih_ref, gs_whh_ref, gs_bih_ref, gs_bhh_ref,
                  lin_w_ref, lin_b_ref, hwy_w_ref, hwy_b_ref,
                  out_ref):
    # --- Conv + ReLU as a single im2col matmul.  Rows are time-major: row = t*B + b.
    conv = jnp.dot(patches_ref[...], conv_w_ref[...],
                   preferred_element_type=jnp.float32) + conv_b_ref[...]
    conv = jnp.maximum(conv, 0.0)                       # (T*B, hidC)

    # --- GRU1: hoist all input gates into one matmul, recurrence only does h @ W_hh^T.
    gi1 = jnp.dot(conv, g1_wih_ref[...],
                  preferred_element_type=jnp.float32) + g1_bih_ref[...]   # (T*B, 3*hidR)
    whh1 = g1_whh_ref[...]
    bhh1 = g1_bhh_ref[...]
    h1 = jnp.zeros((B, HID_R), jnp.float32)
    for t in range(T):
        gh = jnp.dot(h1, whh1, preferred_element_type=jnp.float32) + bhh1
        h1 = _gru_gates(gi1[t * B:(t + 1) * B, :], gh, h1, HID_R)

    # --- Skip GRU.  Hidden rows are ordered (skip_k, batch) => row = k*B + b, so each
    #     time-step's input-gate block is a contiguous slice of the hoisted gate matmul.
    skip_rows = conv[(T - PT * SKIP) * B:, :]                             # (PT*SKIP*B, hidC)
    gis = jnp.dot(skip_rows, gs_wih_ref[...],
                  preferred_element_type=jnp.float32) + gs_bih_ref[...]   # (PT*SKIP*B, 3*hidS)
    whhs = gs_whh_ref[...]
    bhhs = gs_bhh_ref[...]
    sb = SKIP * B
    hs = jnp.zeros((sb, HID_S), jnp.float32)
    for p in range(PT):
        gh = jnp.dot(hs, whhs, preferred_element_type=jnp.float32) + bhhs
        hs = _gru_gates(gis[p * sb:(p + 1) * sb, :], gh, hs, HID_S)

    # --- concat(r, s) along lanes.  hs[k*B:(k+1)*B] is the (B, hidS) block for skip
    #     phase k, so concatenating in k order reproduces s.view(B, skip*hidS) columns.
    feat = jnp.concatenate([h1] + [hs[k * B:(k + 1) * B, :] for k in range(SKIP)],
                           axis=1)                                        # (B, hidR+skip*hidS)
    res = jnp.dot(feat, lin_w_ref[...],
                  preferred_element_type=jnp.float32) + lin_b_ref[...]

    # --- highway (autoregressive) component; z prebuilt in the wrapper.
    res = res + jnp.dot(z_ref[...], hwy_w_ref[...],
                        preferred_element_type=jnp.float32) + hwy_b_ref[...]

    # --- output activation (output_fun == 'sigmoid')
    out_ref[...] = jax.nn.sigmoid(res)                                    # (B, m_y*horizon)


# ------------------------------- wrapper / glue --------------------------------------
def lstnet_pallas(x, params):
    # im2col patches, time-major rows (t*B + b): (T*B, Ck*m_x)
    patches = jnp.stack([x[:, t:t + CK, :].reshape(B, CK * M_X) for t in range(T)],
                        axis=0).reshape(T * B, CK * M_X)
    # highway input
    z = x[:, P - HW:, :].reshape(B, HW * M_X)

    inputs = [
        patches.astype(jnp.float32),
        z.astype(jnp.float32),
        params["conv_w"].reshape(HID_C, CK * M_X).T,     # (Ck*m_x, hidC)
        params["conv_b"][None, :],
        params["g1_wih"].T, params["g1_whh"].T,
        params["g1_bih"][None, :], params["g1_bhh"][None, :],
        params["gs_wih"].T, params["gs_whh"].T,
        params["gs_bih"][None, :], params["gs_bhh"][None, :],
        params["lin_w"].T, params["lin_b"][None, :],
        params["hwy_w"].T, params["hwy_b"][None, :],
    ]
    vspec = pl.BlockSpec(memory_space=pltpu.MemorySpace.VMEM)
    out = pl.pallas_call(
        lstnet_kernel,
        out_shape=jax.ShapeDtypeStruct((B, OUT_DIM), jnp.float32),
        in_specs=[vspec] * len(inputs),
        out_specs=vspec,
    )(*inputs)
    return out.reshape(B, HORIZON, M_Y)


# ------------------------------- pure-JAX reference ----------------------------------
def lstnet_reference(x, p):
    batch = x.shape[0]
    c4 = x.reshape(batch, 1, P, M_X)
    Wc = p["conv_w"].reshape(HID_C, CK * M_X)
    patches = jnp.stack([c4[:, 0, t:t + CK, :].reshape(batch, CK * M_X)
                         for t in range(T)], axis=1)                 # (B, T, Ck*m_x)
    conv = jnp.einsum("btk,ok->bot", patches, Wc) + p["conv_b"][None, :, None]
    c = jax.nn.relu(conv)                                            # (B, hidC, T)

    def gru(seq, wih, whh, bih, bhh, H):
        h = jnp.zeros((seq.shape[1], H), jnp.float32)
        for t in range(seq.shape[0]):
            gi = seq[t] @ wih.T + bih
            gh = h @ whh.T + bhh
            r = jax.nn.sigmoid(gi[:, :H] + gh[:, :H])
            z = jax.nn.sigmoid(gi[:, H:2 * H] + gh[:, H:2 * H])
            n = jnp.tanh(gi[:, 2 * H:] + r * gh[:, 2 * H:])
            h = (1.0 - z) * n + z * h
        return h

    r_seq = jnp.transpose(c, (2, 0, 1))                              # (T, B, hidC)
    r = gru(r_seq, p["g1_wih"], p["g1_whh"], p["g1_bih"], p["g1_bhh"], HID_R)

    s = c[:, :, -PT * SKIP:]
    s = s.reshape(batch, HID_C, PT, SKIP)
    s = jnp.transpose(s, (2, 0, 3, 1)).reshape(PT, batch * SKIP, HID_C)
    hs = gru(s, p["gs_wih"], p["gs_whh"], p["gs_bih"], p["gs_bhh"], HID_S)
    hs = hs.reshape(batch, SKIP * HID_S)

    r = jnp.concatenate([r, hs], axis=1)
    res = r @ p["lin_w"].T + p["lin_b"]
    z = x[:, -HW:, :].reshape(batch, HW * M_X)
    res = res + z @ p["hwy_w"].T + p["hwy_b"]
    res = jax.nn.sigmoid(res)
    return res.reshape(batch, HORIZON, M_Y)


# ------------------------------- parameter init --------------------------------------
def init_params(key):
    ks = jax.random.split(key, 14)

    def n(k, shape, scale=0.1):
        return (scale * jax.random.normal(k, shape)).astype(jnp.float32)

    return {
        "conv_w": n(ks[0], (HID_C, 1, CK, M_X)),
        "conv_b": n(ks[1], (HID_C,)),
        "g1_wih": n(ks[2], (3 * HID_R, HID_C)),
        "g1_whh": n(ks[3], (3 * HID_R, HID_R)),
        "g1_bih": n(ks[4], (3 * HID_R,)),
        "g1_bhh": n(ks[5], (3 * HID_R,)),
        "gs_wih": n(ks[6], (3 * HID_S, HID_C)),
        "gs_whh": n(ks[7], (3 * HID_S, HID_S)),
        "gs_bih": n(ks[8], (3 * HID_S,)),
        "gs_bhh": n(ks[9], (3 * HID_S,)),
        "lin_w": n(ks[10], (OUT_DIM, HID_R + SKIP * HID_S)),
        "lin_b": n(ks[11], (OUT_DIM,)),
        "hwy_w": n(ks[12], (OUT_DIM, HW * M_X)),
        "hwy_b": n(ks[13], (OUT_DIM,)),
    }


if __name__ == "__main__":
    key = jax.random.PRNGKey(0)
    kx, kp = jax.random.split(key)
    x = jax.random.normal(kx, (B, P, M_X), dtype=jnp.float32)
    params = init_params(kp)

    out = jax.block_until_ready(lstnet_pallas(x, params))
    ref = jax.block_until_ready(lstnet_reference(x, params))
    np.testing.assert_allclose(np.asarray(out), np.asarray(ref), rtol=2e-2, atol=5e-3)
    assert out.shape == (B, HORIZON, M_Y)
    print("KERNEL_OK")
</pallas_src>

<mosaic_0001>
module attributes {stable_mosaic.version = 11 : i64} {
  func.func @lstnet_kernel(%arg0: memref<28x12xf32, #tpu.memory_space<vmem>>, %arg1: memref<2x16xf32, #tpu.memory_space<vmem>>, %arg2: memref<12x16xf32, #tpu.memory_space<vmem>>, %arg3: memref<1x16xf32, #tpu.memory_space<vmem>>, %arg4: memref<16x96xf32, #tpu.memory_space<vmem>>, %arg5: memref<32x96xf32, #tpu.memory_space<vmem>>, %arg6: memref<1x96xf32, #tpu.memory_space<vmem>>, %arg7: memref<1x96xf32, #tpu.memory_space<vmem>>, %arg8: memref<16x24xf32, #tpu.memory_space<vmem>>, %arg9: memref<8x24xf32, #tpu.memory_space<vmem>>, %arg10: memref<1x24xf32, #tpu.memory_space<vmem>>, %arg11: memref<1x24xf32, #tpu.memory_space<vmem>>, %arg12: memref<64x4xf32, #tpu.memory_space<vmem>>, %arg13: memref<1x4xf32, #tpu.memory_space<vmem>>, %arg14: memref<16x4xf32, #tpu.memory_space<vmem>>, %arg15: memref<1x4xf32, #tpu.memory_space<vmem>>, %arg16: memref<2x4xf32, #tpu.memory_space<vmem>>) attributes {dimension_semantics = [], scalar_prefetch = 0 : i64, scratch_operands = 0 : i64, tpu.core_type = #tpu.core_type<tc>} {
    %c0 = arith.constant 0 : index
    %c0_0 = arith.constant 0 : index
    %0 = vector.load %arg0[%c0, %c0_0] : memref<28x12xf32, #tpu.memory_space<vmem>>, vector<28x12xf32>
    %c0_1 = arith.constant 0 : index
    %c0_2 = arith.constant 0 : index
    %1 = vector.load %arg2[%c0_1, %c0_2] : memref<12x16xf32, #tpu.memory_space<vmem>>, vector<12x16xf32>
    %cst = arith.constant dense<0.000000e+00> : vector<28x16xf32>
    %2 = tpu.matmul %0, %1, %cst {dimension_numbers = #tpu.dot_dimension_numbers<[1], [0], [0], [1], [0, 0, 1, 1], [], []>} : vector<28x12xf32>, vector<12x16xf32>, vector<28x16xf32> -> vector<28x16xf32>
    %c0_3 = arith.constant 0 : index
    %c0_4 = arith.constant 0 : index
    %3 = vector.load %arg3[%c0_3, %c0_4] : memref<1x16xf32, #tpu.memory_space<vmem>>, vector<1x16xf32>
    %4 = vector.broadcast %3 : vector<1x16xf32> to vector<28x16xf32>
    %5 = arith.addf %2, %4 : vector<28x16xf32>
    %cst_5 = arith.constant 0.000000e+00 : f32
    %6 = vector.broadcast %cst_5 : f32 to vector<28x16xf32>
    %7 = arith.maximumf %5, %6 : vector<28x16xf32>
    %c0_6 = arith.constant 0 : index
    %c0_7 = arith.constant 0 : index
    %8 = vector.load %arg4[%c0_6, %c0_7] : memref<16x96xf32, #tpu.memory_space<vmem>>, vector<16x96xf32>
    %cst_8 = arith.constant dense<0.000000e+00> : vector<28x96xf32>
    %9 = tpu.matmul %7, %8, %cst_8 {dimension_numbers = #tpu.dot_dimension_numbers<[1], [0], [0], [1], [0, 0, 1, 1], [], []>} : vector<28x16xf32>, vector<16x96xf32>, vector<28x96xf32> -> vector<28x96xf32>
    %c0_9 = arith.constant 0 : index
    %c0_10 = arith.constant 0 : index
    %10 = vector.load %arg6[%c0_9, %c0_10] : memref<1x96xf32, #tpu.memory_space<vmem>>, vector<1x96xf32>
    %11 = vector.broadcast %10 : vector<1x96xf32> to vector<28x96xf32>
    %12 = arith.addf %9, %11 : vector<28x96xf32>
    %c0_11 = arith.constant 0 : index
    %c0_12 = arith.constant 0 : index
    %13 = vector.load %arg5[%c0_11, %c0_12] : memref<32x96xf32, #tpu.memory_space<vmem>>, vector<32x96xf32>
    %c0_13 = arith.constant 0 : index
    %c0_14 = arith.constant 0 : index
    %14 = vector.load %arg7[%c0_13, %c0_14] : memref<1x96xf32, #tpu.memory_space<vmem>>, vector<1x96xf32>
    %cst_15 = arith.constant 0.000000e+00 : f32
    %15 = vector.broadcast %cst_15 : f32 to vector<2x32xf32>
    %cst_16 = arith.constant dense<0.000000e+00> : vector<2x96xf32>
    %16 = tpu.matmul %15, %13, %cst_16 {dimension_numbers = #tpu.dot_dimension_numbers<[1], [0], [0], [1], [0, 0, 1, 1], [], []>} : vector<2x32xf32>, vector<32x96xf32>, vector<2x96xf32> -> vector<2x96xf32>
    %17 = vector.broadcast %14 : vector<1x96xf32> to vector<2x96xf32>
    %18 = arith.addf %16, %17 : vector<2x96xf32>
    %19 = vector.extract_strided_slice %12 {offsets = [0, 0], sizes = [2, 96], strides = [1, 1]} : vector<28x96xf32> to vector<2x96xf32>
    %20 = vector.extract_strided_slice %19 {offsets = [0, 0], sizes = [2, 32], strides = [1, 1]} : vector<2x96xf32> to vector<2x32xf32>
    %21 = vector.extract_strided_slice %18 {offsets = [0, 0], sizes = [2, 32], strides = [1, 1]} : vector<2x96xf32> to vector<2x32xf32>
    %22 = arith.addf %20, %21 : vector<2x32xf32>
    %23 = arith.negf %22 : vector<2x32xf32>
    %24 = math.exp %23 : vector<2x32xf32>
    %cst_17 = arith.constant 1.000000e+00 : f32
    %25 = vector.broadcast %cst_17 : f32 to vector<2x32xf32>
    %26 = arith.addf %25, %24 : vector<2x32xf32>
    %27 = arith.divf %25, %26 : vector<2x32xf32>
    %28 = vector.extract_strided_slice %19 {offsets = [0, 32], sizes = [2, 32], strides = [1, 1]} : vector<2x96xf32> to vector<2x32xf32>
    %29 = vector.extract_strided_slice %18 {offsets = [0, 32], sizes = [2, 32], strides = [1, 1]} : vector<2x96xf32> to vector<2x32xf32>
    %30 = arith.addf %28, %29 : vector<2x32xf32>
    %31 = arith.negf %30 : vector<2x32xf32>
    %32 = math.exp %31 : vector<2x32xf32>
    %cst_18 = arith.constant 1.000000e+00 : f32
    %33 = vector.broadcast %cst_18 : f32 to vector<2x32xf32>
    %34 = arith.addf %33, %32 : vector<2x32xf32>
    %35 = arith.divf %33, %34 : vector<2x32xf32>
    %36 = vector.extract_strided_slice %19 {offsets = [0, 64], sizes = [2, 32], strides = [1, 1]} : vector<2x96xf32> to vector<2x32xf32>
    %37 = vector.extract_strided_slice %18 {offsets = [0, 64], sizes = [2, 32], strides = [1, 1]} : vector<2x96xf32> to vector<2x32xf32>
    %38 = arith.mulf %27, %37 : vector<2x32xf32>
    %39 = arith.addf %36, %38 : vector<2x32xf32>
    %40 = math.tanh %39 : vector<2x32xf32>
    %cst_19 = arith.constant 1.000000e+00 : f32
    %41 = vector.broadcast %cst_19 : f32 to vector<2x32xf32>
    %42 = arith.subf %41, %35 : vector<2x32xf32>
    %43 = arith.mulf %42, %40 : vector<2x32xf32>
    %44 = arith.mulf %35, %15 : vector<2x32xf32>
    %45 = arith.addf %43, %44 : vector<2x32xf32>
    %cst_20 = arith.constant dense<0.000000e+00> : vector<2x96xf32>
    %46 = tpu.matmul %45, %13, %cst_20 {dimension_numbers = #tpu.dot_dimension_numbers<[1], [0], [0], [1], [0, 0, 1, 1], [], []>} : vector<2x32xf32>, vector<32x96xf32>, vector<2x96xf32> -> vector<2x96xf32>
    %47 = vector.broadcast %14 : vector<1x96xf32> to vector<2x96xf32>
    %48 = arith.addf %46, %47 : vector<2x96xf32>
    %49 = vector.extract_strided_slice %12 {offsets = [2, 0], sizes = [2, 96], strides = [1, 1]} : vector<28x96xf32> to vector<2x96xf32>
    %50 = vector.extract_strided_slice %49 {offsets = [0, 0], sizes = [2, 32], strides = [1, 1]} : vector<2x96xf32> to vector<2x32xf32>
    %51 = vector.extract_strided_slice %48 {offsets = [0, 0], sizes = [2, 32], strides = [1, 1]} : vector<2x96xf32> to vector<2x32xf32>
    %52 = arith.addf %50, %51 : vector<2x32xf32>
    %53 = arith.negf %52 : vector<2x32xf32>
    %54 = math.exp %53 : vector<2x32xf32>
    %cst_21 = arith.constant 1.000000e+00 : f32
    %55 = vector.broadcast %cst_21 : f32 to vector<2x32xf32>
    %56 = arith.addf %55, %54 : vector<2x32xf32>
    %57 = arith.divf %55, %56 : vector<2x32xf32>
    %58 = vector.extract_strided_slice %49 {offsets = [0, 32], sizes = [2, 32], strides = [1, 1]} : vector<2x96xf32> to vector<2x32xf32>
    %59 = vector.extract_strided_slice %48 {offsets = [0, 32], sizes = [2, 32], strides = [1, 1]} : vector<2x96xf32> to vector<2x32xf32>
    %60 = arith.addf %58, %59 : vector<2x32xf32>
    %61 = arith.negf %60 : vector<2x32xf32>
    %62 = math.exp %61 : vector<2x32xf32>
    %cst_22 = arith.constant 1.000000e+00 : f32
    %63 = vector.broadcast %cst_22 : f32 to vector<2x32xf32>
    %64 = arith.addf %63, %62 : vector<2x32xf32>
    %65 = arith.divf %63, %64 : vector<2x32xf32>
    %66 = vector.extract_strided_slice %49 {offsets = [0, 64], sizes = [2, 32], strides = [1, 1]} : vector<2x96xf32> to vector<2x32xf32>
    %67 = vector.extract_strided_slice %48 {offsets = [0, 64], sizes = [2, 32], strides = [1, 1]} : vector<2x96xf32> to vector<2x32xf32>
    %68 = arith.mulf %57, %67 : vector<2x32xf32>
    %69 = arith.addf %66, %68 : vector<2x32xf32>
    %70 = math.tanh %69 : vector<2x32xf32>
    %cst_23 = arith.constant 1.000000e+00 : f32
    %71 = vector.broadcast %cst_23 : f32 to vector<2x32xf32>
    %72 = arith.subf %71, %65 : vector<2x32xf32>
    %73 = arith.mulf %72, %70 : vector<2x32xf32>
    %74 = arith.mulf %65, %45 : vector<2x32xf32>
    %75 = arith.addf %73, %74 : vector<2x32xf32>
    %cst_24 = arith.constant dense<0.000000e+00> : vector<2x96xf32>
    %76 = tpu.matmul %75, %13, %cst_24 {dimension_numbers = #tpu.dot_dimension_numbers<[1], [0], [0], [1], [0, 0, 1, 1], [], []>} : vector<2x32xf32>, vector<32x96xf32>, vector<2x96xf32> -> vector<2x96xf32>
    %77 = vector.broadcast %14 : vector<1x96xf32> to vector<2x96xf32>
    %78 = arith.addf %76, %77 : vector<2x96xf32>
    %79 = vector.extract_strided_slice %12 {offsets = [4, 0], sizes = [2, 96], strides = [1, 1]} : vector<28x96xf32> to vector<2x96xf32>
    %80 = vector.extract_strided_slice %79 {offsets = [0, 0], sizes = [2, 32], strides = [1, 1]} : vector<2x96xf32> to vector<2x32xf32>
    %81 = vector.extract_strided_slice %78 {offsets = [0, 0], sizes = [2, 32], strides = [1, 1]} : vector<2x96xf32> to vector<2x32xf32>
    %82 = arith.addf %80, %81 : vector<2x32xf32>
    %83 = arith.negf %82 : vector<2x32xf32>
    %84 = math.exp %83 : vector<2x32xf32>
    %cst_25 = arith.constant 1.000000e+00 : f32
    %85 = vector.broadcast %cst_25 : f32 to vector<2x32xf32>
    %86 = arith.addf %85, %84 : vector<2x32xf32>
    %87 = arith.divf %85, %86 : vector<2x32xf32>
    %88 = vector.extract_strided_slice %79 {offsets = [0, 32], sizes = [2, 32], strides = [1, 1]} : vector<2x96xf32> to vector<2x32xf32>
    %89 = vector.extract_strided_slice %78 {offsets = [0, 32], sizes = [2, 32], strides = [1, 1]} : vector<2x96xf32> to vector<2x32xf32>
    %90 = arith.addf %88, %89 : vector<2x32xf32>
    %91 = arith.negf %90 : vector<2x32xf32>
    %92 = math.exp %91 : vector<2x32xf32>
    %cst_26 = arith.constant 1.000000e+00 : f32
    %93 = vector.broadcast %cst_26 : f32 to vector<2x32xf32>
    %94 = arith.addf %93, %92 : vector<2x32xf32>
    %95 = arith.divf %93, %94 : vector<2x32xf32>
    %96 = vector.extract_strided_slice %79 {offsets = [0, 64], sizes = [2, 32], strides = [1, 1]} : vector<2x96xf32> to vector<2x32xf32>
    %97 = vector.extract_strided_slice %78 {offsets = [0, 64], sizes = [2, 32], strides = [1, 1]} : vector<2x96xf32> to vector<2x32xf32>
    %98 = arith.mulf %87, %97 : vector<2x32xf32>
    %99 = arith.addf %96, %98 : vector<2x32xf32>
    %100 = math.tanh %99 : vector<2x32xf32>
    %cst_27 = arith.constant 1.000000e+00 : f32
    %101 = vector.broadcast %cst_27 : f32 to vector<2x32xf32>
    %102 = arith.subf %101, %95 : vector<2x32xf32>
    %103 = arith.mulf %102, %100 : vector<2x32xf32>
    %104 = arith.mulf %95, %75 : vector<2x32xf32>
    %105 = arith.addf %103, %104 : vector<2x32xf32>
    %cst_28 = arith.constant dense<0.000000e+00> : vector<2x96xf32>
    %106 = tpu.matmul %105, %13, %cst_28 {dimension_numbers = #tpu.dot_dimension_numbers<[1], [0], [0], [1], [0, 0, 1, 1], [], []>} : vector<2x32xf32>, vector<32x96xf32>, vector<2x96xf32> -> vector<2x96xf32>
    %107 = vector.broadcast %14 : vector<1x96xf32> to vector<2x96xf32>
    %108 = arith.addf %106, %107 : vector<2x96xf32>
    %109 = vector.extract_strided_slice %12 {offsets = [6, 0], sizes = [2, 96], strides = [1, 1]} : vector<28x96xf32> to vector<2x96xf32>
    %110 = vector.extract_strided_slice %109 {offsets = [0, 0], sizes = [2, 32], strides = [1, 1]} : vector<2x96xf32> to vector<2x32xf32>
    %111 = vector.extract_strided_slice %108 {offsets = [0, 0], sizes = [2, 32], strides = [1, 1]} : vector<2x96xf32> to vector<2x32xf32>
    %112 = arith.addf %110, %111 : vector<2x32xf32>
    %113 = arith.negf %112 : vector<2x32xf32>
    %114 = math.exp %113 : vector<2x32xf32>
    %cst_29 = arith.constant 1.000000e+00 : f32
    %115 = vector.broadcast %cst_29 : f32 to vector<2x32xf32>
    %116 = arith.addf %115, %114 : vector<2x32xf32>
    %117 = arith.divf %115, %116 : vector<2x32xf32>
    %118 = vector.extract_strided_slice %109 {offsets = [0, 32], sizes = [2, 32], strides = [1, 1]} : vector<2x96xf32> to vector<2x32xf32>
    %119 = vector.extract_strided_slice %108 {offsets = [0, 32], sizes = [2, 32], strides = [1, 1]} : vector<2x96xf32> to vector<2x32xf32>
    %120 = arith.addf %118, %119 : vector<2x32xf32>
    %121 = arith.negf %120 : vector<2x32xf32>
    %122 = math.exp %121 : vector<2x32xf32>
    %cst_30 = arith.constant 1.000000e+00 : f32
    %123 = vector.broadcast %cst_30 : f32 to vector<2x32xf32>
    %124 = arith.addf %123, %122 : vector<2x32xf32>
    %125 = arith.divf %123, %124 : vector<2x32xf32>
    %126 = vector.extract_strided_slice %109 {offsets = [0, 64], sizes = [2, 32], strides = [1, 1]} : vector<2x96xf32> to vector<2x32xf32>
    %127 = vector.extract_strided_slice %108 {offsets = [0, 64], sizes = [2, 32], strides = [1, 1]} : vector<2x96xf32> to vector<2x32xf32>
    %128 = arith.mulf %117, %127 : vector<2x32xf32>
    %129 = arith.addf %126, %128 : vector<2x32xf32>
    %130 = math.tanh %129 : vector<2x32xf32>
    %cst_31 = arith.constant 1.000000e+00 : f32
    %131 = vector.broadcast %cst_31 : f32 to vector<2x32xf32>
    %132 = arith.subf %131, %125 : vector<2x32xf32>
    %133 = arith.mulf %132, %130 : vector<2x32xf32>
    %134 = arith.mulf %125, %105 : vector<2x32xf32>
    %135 = arith.addf %133, %134 : vector<2x32xf32>
    %cst_32 = arith.constant dense<0.000000e+00> : vector<2x96xf32>
    %136 = tpu.matmul %135, %13, %cst_32 {dimension_numbers = #tpu.dot_dimension_numbers<[1], [0], [0], [1], [0, 0, 1, 1], [], []>} : vector<2x32xf32>, vector<32x96xf32>, vector<2x96xf32> -> vector<2x96xf32>
    %137 = vector.broadcast %14 : vector<1x96xf32> to vector<2x96xf32>
    %138 = arith.addf %136, %137 : vector<2x96xf32>
    %139 = vector.extract_strided_slice %12 {offsets = [8, 0], sizes = [2, 96], strides = [1, 1]} : vector<28x96xf32> to vector<2x96xf32>
    %140 = vector.extract_strided_slice %139 {offsets = [0, 0], sizes = [2, 32], strides = [1, 1]} : vector<2x96xf32> to vector<2x32xf32>
    %141 = vector.extract_strided_slice %138 {offsets = [0, 0], sizes = [2, 32], strides = [1, 1]} : vector<2x96xf32> to vector<2x32xf32>
    %142 = arith.addf %140, %141 : vector<2x32xf32>
    %143 = arith.negf %142 : vector<2x32xf32>
    %144 = math.exp %143 : vector<2x32xf32>
    %cst_33 = arith.constant 1.000000e+00 : f32
    %145 = vector.broadcast %cst_33 : f32 to vector<2x32xf32>
    %146 = arith.addf %145, %144 : vector<2x32xf32>
    %147 = arith.divf %145, %146 : vector<2x32xf32>
    %148 = vector.extract_strided_slice %139 {offsets = [0, 32], sizes = [2, 32], strides = [1, 1]} : vector<2x96xf32> to vector<2x32xf32>
    %149 = vector.extract_strided_slice %138 {offsets = [0, 32], sizes = [2, 32], strides = [1, 1]} : vector<2x96xf32> to vector<2x32xf32>
    %150 = arith.addf %148, %149 : vector<2x32xf32>
    %151 = arith.negf %150 : vector<2x32xf32>
    %152 = math.exp %151 : vector<2x32xf32>
    %cst_34 = arith.constant 1.000000e+00 : f32
    %153 = vector.broadcast %cst_34 : f32 to vector<2x32xf32>
    %154 = arith.addf %153, %152 : vector<2x32xf32>
    %155 = arith.divf %153, %154 : vector<2x32xf32>
    %156 = vector.extract_strided_slice %139 {offsets = [0, 64], sizes = [2, 32], strides = [1, 1]} : vector<2x96xf32> to vector<2x32xf32>
    %157 = vector.extract_strided_slice %138 {offsets = [0, 64], sizes = [2, 32], strides = [1, 1]} : vector<2x96xf32> to vector<2x32xf32>
    %158 = arith.mulf %147, %157 : vector<2x32xf32>
    %159 = arith.addf %156, %158 : vector<2x32xf32>
    %160 = math.tanh %159 : vector<2x32xf32>
    %cst_35 = arith.constant 1.000000e+00 : f32
    %161 = vector.broadcast %cst_35 : f32 to vector<2x32xf32>
    %162 = arith.subf %161, %155 : vector<2x32xf32>
    %163 = arith.mulf %162, %160 : vector<2x32xf32>
    %164 = arith.mulf %155, %135 : vector<2x32xf32>
    %165 = arith.addf %163, %164 : vector<2x32xf32>
    %cst_36 = arith.constant dense<0.000000e+00> : vector<2x96xf32>
    %166 = tpu.matmul %165, %13, %cst_36 {dimension_numbers = #tpu.dot_dimension_numbers<[1], [0], [0], [1], [0, 0, 1, 1], [], []>} : vector<2x32xf32>, vector<32x96xf32>, vector<2x96xf32> -> vector<2x96xf32>
    %167 = vector.broadcast %14 : vector<1x96xf32> to vector<2x96xf32>
    %168 = arith.addf %166, %167 : vector<2x96xf32>
    %169 = vector.extract_strided_slice %12 {offsets = [10, 0], sizes = [2, 96], strides = [1, 1]} : vector<28x96xf32> to vector<2x96xf32>
    %170 = vector.extract_strided_slice %169 {offsets = [0, 0], sizes = [2, 32], strides = [1, 1]} : vector<2x96xf32> to vector<2x32xf32>
    %171 = vector.extract_strided_slice %168 {offsets = [0, 0], sizes = [2, 32], strides = [1, 1]} : vector<2x96xf32> to vector<2x32xf32>
    %172 = arith.addf %170, %171 : vector<2x32xf32>
    %173 = arith.negf %172 : vector<2x32xf32>
    %174 = math.exp %173 : vector<2x32xf32>
    %cst_37 = arith.constant 1.000000e+00 : f32
    %175 = vector.broadcast %cst_37 : f32 to vector<2x32xf32>
    %176 = arith.addf %175, %174 : vector<2x32xf32>
    %177 = arith.divf %175, %176 : vector<2x32xf32>
    %178 = vector.extract_strided_slice %169 {offsets = [0, 32], sizes = [2, 32], strides = [1, 1]} : vector<2x96xf32> to vector<2x32xf32>
    %179 = vector.extract_strided_slice %168 {offsets = [0, 32], sizes = [2, 32], strides = [1, 1]} : vector<2x96xf32> to vector<2x32xf32>
    %180 = arith.addf %178, %179 : vector<2x32xf32>
    %181 = arith.negf %180 : vector<2x32xf32>
    %182 = math.exp %181 : vector<2x32xf32>
    %cst_38 = arith.constant 1.000000e+00 : f32
    %183 = vector.broadcast %cst_38 : f32 to vector<2x32xf32>
    %184 = arith.addf %183, %182 : vector<2x32xf32>
    %185 = arith.divf %183, %184 : vector<2x32xf32>
    %186 = vector.extract_strided_slice %169 {offsets = [0, 64], sizes = [2, 32], strides = [1, 1]} : vector<2x96xf32> to vector<2x32xf32>
    %187 = vector.extract_strided_slice %168 {offsets = [0, 64], sizes = [2, 32], strides = [1, 1]} : vector<2x96xf32> to vector<2x32xf32>
    %188 = arith.mulf %177, %187 : vector<2x32xf32>
    %189 = arith.addf %186, %188 : vector<2x32xf32>
    %190 = math.tanh %189 : vector<2x32xf32>
    %cst_39 = arith.constant 1.000000e+00 : f32
    %191 = vector.broadcast %cst_39 : f32 to vector<2x32xf32>
    %192 = arith.subf %191, %185 : vector<2x32xf32>
    %193 = arith.mulf %192, %190 : vector<2x32xf32>
    %194 = arith.mulf %185, %165 : vector<2x32xf32>
    %195 = arith.addf %193, %194 : vector<2x32xf32>
    %cst_40 = arith.constant dense<0.000000e+00> : vector<2x96xf32>
    %196 = tpu.matmul %195, %13, %cst_40 {dimension_numbers = #tpu.dot_dimension_numbers<[1], [0], [0], [1], [0, 0, 1, 1], [], []>} : vector<2x32xf32>, vector<32x96xf32>, vector<2x96xf32> -> vector<2x96xf32>
    %197 = vector.broadcast %14 : vector<1x96xf32> to vector<2x96xf32>
    %198 = arith.addf %196, %197 : vector<2x96xf32>
    %199 = vector.extract_strided_slice %12 {offsets = [12, 0], sizes = [2, 96], strides = [1, 1]} : vector<28x96xf32> to vector<2x96xf32>
    %200 = vector.extract_strided_slice %199 {offsets = [0, 0], sizes = [2, 32], strides = [1, 1]} : vector<2x96xf32> to vector<2x32xf32>
    %201 = vector.extract_strided_slice %198 {offsets = [0, 0], sizes = [2, 32], strides = [1, 1]} : vector<2x96xf32> to vector<2x32xf32>
    %202 = arith.addf %200, %201 : vector<2x32xf32>
    %203 = arith.negf %202 : vector<2x32xf32>
    %204 = math.exp %203 : vector<2x32xf32>
    %cst_41 = arith.constant 1.000000e+00 : f32
    %205 = vector.broadcast %cst_41 : f32 to vector<2x32xf32>
    %206 = arith.addf %205, %204 : vector<2x32xf32>
    %207 = arith.divf %205, %206 : vector<2x32xf32>
    %208 = vector.extract_strided_slice %199 {offsets = [0, 32], sizes = [2, 32], strides = [1, 1]} : vector<2x96xf32> to vector<2x32xf32>
    %209 = vector.extract_strided_slice %198 {offsets = [0, 32], sizes = [2, 32], strides = [1, 1]} : vector<2x96xf32> to vector<2x32xf32>
    %210 = arith.addf %208, %209 : vector<2x32xf32>
    %211 = arith.negf %210 : vector<2x32xf32>
    %212 = math.exp %211 : vector<2x32xf32>
    %cst_42 = arith.constant 1.000000e+00 : f32
    %213 = vector.broadcast %cst_42 : f32 to vector<2x32xf32>
    %214 = arith.addf %213, %212 : vector<2x32xf32>
    %215 = arith.divf %213, %214 : vector<2x32xf32>
    %216 = vector.extract_strided_slice %199 {offsets = [0, 64], sizes = [2, 32], strides = [1, 1]} : vector<2x96xf32> to vector<2x32xf32>
    %217 = vector.extract_strided_slice %198 {offsets = [0, 64], sizes = [2, 32], strides = [1, 1]} : vector<2x96xf32> to vector<2x32xf32>
    %218 = arith.mulf %207, %217 : vector<2x32xf32>
    %219 = arith.addf %216, %218 : vector<2x32xf32>
    %220 = math.tanh %219 : vector<2x32xf32>
    %cst_43 = arith.constant 1.000000e+00 : f32
    %221 = vector.broadcast %cst_43 : f32 to vector<2x32xf32>
    %222 = arith.subf %221, %215 : vector<2x32xf32>
    %223 = arith.mulf %222, %220 : vector<2x32xf32>
    %224 = arith.mulf %215, %195 : vector<2x32xf32>
    %225 = arith.addf %223, %224 : vector<2x32xf32>
    %cst_44 = arith.constant dense<0.000000e+00> : vector<2x96xf32>
    %226 = tpu.matmul %225, %13, %cst_44 {dimension_numbers = #tpu.dot_dimension_numbers<[1], [0], [0], [1], [0, 0, 1, 1], [], []>} : vector<2x32xf32>, vector<32x96xf32>, vector<2x96xf32> -> vector<2x96xf32>
    %227 = vector.broadcast %14 : vector<1x96xf32> to vector<2x96xf32>
    %228 = arith.addf %226, %227 : vector<2x96xf32>
    %229 = vector.extract_strided_slice %12 {offsets = [14, 0], sizes = [2, 96], strides = [1, 1]} : vector<28x96xf32> to vector<2x96xf32>
    %230 = vector.extract_strided_slice %229 {offsets = [0, 0], sizes = [2, 32], strides = [1, 1]} : vector<2x96xf32> to vector<2x32xf32>
    %231 = vector.extract_strided_slice %228 {offsets = [0, 0], sizes = [2, 32], strides = [1, 1]} : vector<2x96xf32> to vector<2x32xf32>
    %232 = arith.addf %230, %231 : vector<2x32xf32>
    %233 = arith.negf %232 : vector<2x32xf32>
    %234 = math.exp %233 : vector<2x32xf32>
    %cst_45 = arith.constant 1.000000e+00 : f32
    %235 = vector.broadcast %cst_45 : f32 to vector<2x32xf32>
    %236 = arith.addf %235, %234 : vector<2x32xf32>
    %237 = arith.divf %235, %236 : vector<2x32xf32>
    %238 = vector.extract_strided_slice %229 {offsets = [0, 32], sizes = [2, 32], strides = [1, 1]} : vector<2x96xf32> to vector<2x32xf32>
    %239 = vector.extract_strided_slice %228 {offsets = [0, 32], sizes = [2, 32], strides = [1, 1]} : vector<2x96xf32> to vector<2x32xf32>
    %240 = arith.addf %238, %239 : vector<2x32xf32>
    %241 = arith.negf %240 : vector<2x32xf32>
    %242 = math.exp %241 : vector<2x32xf32>
    %cst_46 = arith.constant 1.000000e+00 : f32
    %243 = vector.broadcast %cst_46 : f32 to vector<2x32xf32>
    %244 = arith.addf %243, %242 : vector<2x32xf32>
    %245 = arith.divf %243, %244 : vector<2x32xf32>
    %246 = vector.extract_strided_slice %229 {offsets = [0, 64], sizes = [2, 32], strides = [1, 1]} : vector<2x96xf32> to vector<2x32xf32>
    %247 = vector.extract_strided_slice %228 {offsets = [0, 64], sizes = [2, 32], strides = [1, 1]} : vector<2x96xf32> to vector<2x32xf32>
    %248 = arith.mulf %237, %247 : vector<2x32xf32>
    %249 = arith.addf %246, %248 : vector<2x32xf32>
    %250 = math.tanh %249 : vector<2x32xf32>
    %cst_47 = arith.constant 1.000000e+00 : f32
    %251 = vector.broadcast %cst_47 : f32 to vector<2x32xf32>
    %252 = arith.subf %251, %245 : vector<2x32xf32>
    %253 = arith.mulf %252, %250 : vector<2x32xf32>
    %254 = arith.mulf %245, %225 : vector<2x32xf32>
    %255 = arith.addf %253, %254 : vector<2x32xf32>
    %cst_48 = arith.constant dense<0.000000e+00> : vector<2x96xf32>
    %256 = tpu.matmul %255, %13, %cst_48 {dimension_numbers = #tpu.dot_dimension_numbers<[1], [0], [0], [1], [0, 0, 1, 1], [], []>} : vector<2x32xf32>, vector<32x96xf32>, vector<2x96xf32> -> vector<2x96xf32>
    %257 = vector.broadcast %14 : vector<1x96xf32> to vector<2x96xf32>
    %258 = arith.addf %256, %257 : vector<2x96xf32>
    %259 = vector.extract_strided_slice %12 {offsets = [16, 0], sizes = [2, 96], strides = [1, 1]} : vector<28x96xf32> to vector<2x96xf32>
    %260 = vector.extract_strided_slice %259 {offsets = [0, 0], sizes = [2, 32], strides = [1, 1]} : vector<2x96xf32> to vector<2x32xf32>
    %261 = vector.extract_strided_slice %258 {offsets = [0, 0], sizes = [2, 32], strides = [1, 1]} : vector<2x96xf32> to vector<2x32xf32>
    %262 = arith.addf %260, %261 : vector<2x32xf32>
    %263 = arith.negf %262 : vector<2x32xf32>
    %264 = math.exp %263 : vector<2x32xf32>
    %cst_49 = arith.constant 1.000000e+00 : f32
    %265 = vector.broadcast %cst_49 : f32 to vector<2x32xf32>
    %266 = arith.addf %265, %264 : vector<2x32xf32>
    %267 = arith.divf %265, %266 : vector<2x32xf32>
    %268 = vector.extract_strided_slice %259 {offsets = [0, 32], sizes = [2, 32], strides = [1, 1]} : vector<2x96xf32> to vector<2x32xf32>
    %269 = vector.extract_strided_slice %258 {offsets = [0, 32], sizes = [2, 32], strides = [1, 1]} : vector<2x96xf32> to vector<2x32xf32>
    %270 = arith.addf %268, %269 : vector<2x32xf32>
    %271 = arith.negf %270 : vector<2x32xf32>
    %272 = math.exp %271 : vector<2x32xf32>
    %cst_50 = arith.constant 1.000000e+00 : f32
    %273 = vector.broadcast %cst_50 : f32 to vector<2x32xf32>
    %274 = arith.addf %273, %272 : vector<2x32xf32>
    %275 = arith.divf %273, %274 : vector<2x32xf32>
    %276 = vector.extract_strided_slice %259 {offsets = [0, 64], sizes = [2, 32], strides = [1, 1]} : vector<2x96xf32> to vector<2x32xf32>
    %277 = vector.extract_strided_slice %258 {offsets = [0, 64], sizes = [2, 32], strides = [1, 1]} : vector<2x96xf32> to vector<2x32xf32>
    %278 = arith.mulf %267, %277 : vector<2x32xf32>
    %279 = arith.addf %276, %278 : vector<2x32xf32>
    %280 = math.tanh %279 : vector<2x32xf32>
    %cst_51 = arith.constant 1.000000e+00 : f32
    %281 = vector.broadcast %cst_51 : f32 to vector<2x32xf32>
    %282 = arith.subf %281, %275 : vector<2x32xf32>
    %283 = arith.mulf %282, %280 : vector<2x32xf32>
    %284 = arith.mulf %275, %255 : vector<2x32xf32>
    %285 = arith.addf %283, %284 : vector<2x32xf32>
    %cst_52 = arith.constant dense<0.000000e+00> : vector<2x96xf32>
    %286 = tpu.matmul %285, %13, %cst_52 {dimension_numbers = #tpu.dot_dimension_numbers<[1], [0], [0], [1], [0, 0, 1, 1], [], []>} : vector<2x32xf32>, vector<32x96xf32>, vector<2x96xf32> -> vector<2x96xf32>
    %287 = vector.broadcast %14 : vector<1x96xf32> to vector<2x96xf32>
    %288 = arith.addf %286, %287 : vector<2x96xf32>
    %289 = vector.extract_strided_slice %12 {offsets = [18, 0], sizes = [2, 96], strides = [1, 1]} : vector<28x96xf32> to vector<2x96xf32>
    %290 = vector.extract_strided_slice %289 {offsets = [0, 0], sizes = [2, 32], strides = [1, 1]} : vector<2x96xf32> to vector<2x32xf32>
    %291 = vector.extract_strided_slice %288 {offsets = [0, 0], sizes = [2, 32], strides = [1, 1]} : vector<2x96xf32> to vector<2x32xf32>
    %292 = arith.addf %290, %291 : vector<2x32xf32>
    %293 = arith.negf %292 : vector<2x32xf32>
    %294 = math.exp %293 : vector<2x32xf32>
    %cst_53 = arith.constant 1.000000e+00 : f32
    %295 = vector.broadcast %cst_53 : f32 to vector<2x32xf32>
    %296 = arith.addf %295, %294 : vector<2x32xf32>
    %297 = arith.divf %295, %296 : vector<2x32xf32>
    %298 = vector.extract_strided_slice %289 {offsets = [0, 32], sizes = [2, 32], strides = [1, 1]} : vector<2x96xf32> to vector<2x32xf32>
    %299 = vector.extract_strided_slice %288 {offsets = [0, 32], sizes = [2, 32], strides = [1, 1]} : vector<2x96xf32> to vector<2x32xf32>
    %300 = arith.addf %298, %299 : vector<2x32xf32>
    %301 = arith.negf %300 : vector<2x32xf32>
    %302 = math.exp %301 : vector<2x32xf32>
    %cst_54 = arith.constant 1.000000e+00 : f32
    %303 = vector.broadcast %cst_54 : f32 to vector<2x32xf32>
    %304 = arith.addf %303, %302 : vector<2x32xf32>
    %305 = arith.divf %303, %304 : vector<2x32xf32>
    %306 = vector.extract_strided_slice %289 {offsets = [0, 64], sizes = [2, 32], strides = [1, 1]} : vector<2x96xf32> to vector<2x32xf32>
    %307 = vector.extract_strided_slice %288 {offsets = [0, 64], sizes = [2, 32], strides = [1, 1]} : vector<2x96xf32> to vector<2x32xf32>
    %308 = arith.mulf %297, %307 : vector<2x32xf32>
    %309 = arith.addf %306, %308 : vector<2x32xf32>
    %310 = math.tanh %309 : vector<2x32xf32>
    %cst_55 = arith.constant 1.000000e+00 : f32
    %311 = vector.broadcast %cst_55 : f32 to vector<2x32xf32>
    %312 = arith.subf %311, %305 : vector<2x32xf32>
    %313 = arith.mulf %312, %310 : vector<2x32xf32>
    %314 = arith.mulf %305, %285 : vector<2x32xf32>
    %315 = arith.addf %313, %314 : vector<2x32xf32>
    %cst_56 = arith.constant dense<0.000000e+00> : vector<2x96xf32>
    %316 = tpu.matmul %315, %13, %cst_56 {dimension_numbers = #tpu.dot_dimension_numbers<[1], [0], [0], [1], [0, 0, 1, 1], [], []>} : vector<2x32xf32>, vector<32x96xf32>, vector<2x96xf32> -> vector<2x96xf32>
    %317 = vector.broadcast %14 : vector<1x96xf32> to vector<2x96xf32>
    %318 = arith.addf %316, %317 : vector<2x96xf32>
    %319 = vector.extract_strided_slice %12 {offsets = [20, 0], sizes = [2, 96], strides = [1, 1]} : vector<28x96xf32> to vector<2x96xf32>
    %320 = vector.extract_strided_slice %319 {offsets = [0, 0], sizes = [2, 32], strides = [1, 1]} : vector<2x96xf32> to vector<2x32xf32>
    %321 = vector.extract_strided_slice %318 {offsets = [0, 0], sizes = [2, 32], strides = [1, 1]} : vector<2x96xf32> to vector<2x32xf32>
    %322 = arith.addf %320, %321 : vector<2x32xf32>
    %323 = arith.negf %322 : vector<2x32xf32>
    %324 = math.exp %323 : vector<2x32xf32>
    %cst_57 = arith.constant 1.000000e+00 : f32
    %325 = vector.broadcast %cst_57 : f32 to vector<2x32xf32>
    %326 = arith.addf %325, %324 : vector<2x32xf32>
    %327 = arith.divf %325, %326 : vector<2x32xf32>
    %328 = vector.extract_strided_slice %319 {offsets = [0, 32], sizes = [2, 32], strides = [1, 1]} : vector<2x96xf32> to vector<2x32xf32>
    %329 = vector.extract_strided_slice %318 {offsets = [0, 32], sizes = [2, 32], strides = [1, 1]} : vector<2x96xf32> to vector<2x32xf32>
    %330 = arith.addf %328, %329 : vector<2x32xf32>
    %331 = arith.negf %330 : vector<2x32xf32>
    %332 = math.exp %331 : vector<2x32xf32>
    %cst_58 = arith.constant 1.000000e+00 : f32
    %333 = vector.broadcast %cst_58 : f32 to vector<2x32xf32>
    %334 = arith.addf %333, %332 : vector<2x32xf32>
    %335 = arith.divf %333, %334 : vector<2x32xf32>
    %336 = vector.extract_strided_slice %319 {offsets = [0, 64], sizes = [2, 32], strides = [1, 1]} : vector<2x96xf32> to vector<2x32xf32>
    %337 = vector.extract_strided_slice %318 {offsets = [0, 64], sizes = [2, 32], strides = [1, 1]} : vector<2x96xf32> to vector<2x32xf32>
    %338 = arith.mulf %327, %337 : vector<2x32xf32>
    %339 = arith.addf %336, %338 : vector<2x32xf32>
    %340 = math.tanh %339 : vector<2x32xf32>
    %cst_59 = arith.constant 1.000000e+00 : f32
    %341 = vector.broadcast %cst_59 : f32 to vector<2x32xf32>
    %342 = arith.subf %341, %335 : vector<2x32xf32>
    %343 = arith.mulf %342, %340 : vector<2x32xf32>
    %344 = arith.mulf %335, %315 : vector<2x32xf32>
    %345 = arith.addf %343, %344 : vector<2x32xf32>
    %cst_60 = arith.constant dense<0.000000e+00> : vector<2x96xf32>
    %346 = tpu.matmul %345, %13, %cst_60 {dimension_numbers = #tpu.dot_dimension_numbers<[1], [0], [0], [1], [0, 0, 1, 1], [], []>} : vector<2x32xf32>, vector<32x96xf32>, vector<2x96xf32> -> vector<2x96xf32>
    %347 = vector.broadcast %14 : vector<1x96xf32> to vector<2x96xf32>
    %348 = arith.addf %346, %347 : vector<2x96xf32>
    %349 = vector.extract_strided_slice %12 {offsets = [22, 0], sizes = [2, 96], strides = [1, 1]} : vector<28x96xf32> to vector<2x96xf32>
    %350 = vector.extract_strided_slice %349 {offsets = [0, 0], sizes = [2, 32], strides = [1, 1]} : vector<2x96xf32> to vector<2x32xf32>
    %351 = vector.extract_strided_slice %348 {offsets = [0, 0], sizes = [2, 32], strides = [1, 1]} : vector<2x96xf32> to vector<2x32xf32>
    %352 = arith.addf %350, %351 : vector<2x32xf32>
    %353 = arith.negf %352 : vector<2x32xf32>
    %354 = math.exp %353 : vector<2x32xf32>
    %cst_61 = arith.constant 1.000000e+00 : f32
    %355 = vector.broadcast %cst_61 : f32 to vector<2x32xf32>
    %356 = arith.addf %355, %354 : vector<2x32xf32>
    %357 = arith.divf %355, %356 : vector<2x32xf32>
    %358 = vector.extract_strided_slice %349 {offsets = [0, 32], sizes = [2, 32], strides = [1, 1]} : vector<2x96xf32> to vector<2x32xf32>
    %359 = vector.extract_strided_slice %348 {offsets = [0, 32], sizes = [2, 32], strides = [1, 1]} : vector<2x96xf32> to vector<2x32xf32>
    %360 = arith.addf %358, %359 : vector<2x32xf32>
    %361 = arith.negf %360 : vector<2x32xf32>
    %362 = math.exp %361 : vector<2x32xf32>
    %cst_62 = arith.constant 1.000000e+00 : f32
    %363 = vector.broadcast %cst_62 : f32 to vector<2x32xf32>
    %364 = arith.addf %363, %362 : vector<2x32xf32>
    %365 = arith.divf %363, %364 : vector<2x32xf32>
    %366 = vector.extract_strided_slice %349 {offsets = [0, 64], sizes = [2, 32], strides = [1, 1]} : vector<2x96xf32> to vector<2x32xf32>
    %367 = vector.extract_strided_slice %348 {offsets = [0, 64], sizes = [2, 32], strides = [1, 1]} : vector<2x96xf32> to vector<2x32xf32>
    %368 = arith.mulf %357, %367 : vector<2x32xf32>
    %369 = arith.addf %366, %368 : vector<2x32xf32>
    %370 = math.tanh %369 : vector<2x32xf32>
    %cst_63 = arith.constant 1.000000e+00 : f32
    %371 = vector.broadcast %cst_63 : f32 to vector<2x32xf32>
    %372 = arith.subf %371, %365 : vector<2x32xf32>
    %373 = arith.mulf %372, %370 : vector<2x32xf32>
    %374 = arith.mulf %365, %345 : vector<2x32xf32>
    %375 = arith.addf %373, %374 : vector<2x32xf32>
    %cst_64 = arith.constant dense<0.000000e+00> : vector<2x96xf32>
    %376 = tpu.matmul %375, %13, %cst_64 {dimension_numbers = #tpu.dot_dimension_numbers<[1], [0], [0], [1], [0, 0, 1, 1], [], []>} : vector<2x32xf32>, vector<32x96xf32>, vector<2x96xf32> -> vector<2x96xf32>
    %377 = vector.broadcast %14 : vector<1x96xf32> to vector<2x96xf32>
    %378 = arith.addf %376, %377 : vector<2x96xf32>
    %379 = vector.extract_strided_slice %12 {offsets = [24, 0], sizes = [2, 96], strides = [1, 1]} : vector<28x96xf32> to vector<2x96xf32>
    %380 = vector.extract_strided_slice %379 {offsets = [0, 0], sizes = [2, 32], strides = [1, 1]} : vector<2x96xf32> to vector<2x32xf32>
    %381 = vector.extract_strided_slice %378 {offsets = [0, 0], sizes = [2, 32], strides = [1, 1]} : vector<2x96xf32> to vector<2x32xf32>
    %382 = arith.addf %380, %381 : vector<2x32xf32>
    %383 = arith.negf %382 : vector<2x32xf32>
    %384 = math.exp %383 : vector<2x32xf32>
    %cst_65 = arith.constant 1.000000e+00 : f32
    %385 = vector.broadcast %cst_65 : f32 to vector<2x32xf32>
    %386 = arith.addf %385, %384 : vector<2x32xf32>
    %387 = arith.divf %385, %386 : vector<2x32xf32>
    %388 = vector.extract_strided_slice %379 {offsets = [0, 32], sizes = [2, 32], strides = [1, 1]} : vector<2x96xf32> to vector<2x32xf32>
    %389 = vector.extract_strided_slice %378 {offsets = [0, 32], sizes = [2, 32], strides = [1, 1]} : vector<2x96xf32> to vector<2x32xf32>
    %390 = arith.addf %388, %389 : vector<2x32xf32>
    %391 = arith.negf %390 : vector<2x32xf32>
    %392 = math.exp %391 : vector<2x32xf32>
    %cst_66 = arith.constant 1.000000e+00 : f32
    %393 = vector.broadcast %cst_66 : f32 to vector<2x32xf32>
    %394 = arith.addf %393, %392 : vector<2x32xf32>
    %395 = arith.divf %393, %394 : vector<2x32xf32>
    %396 = vector.extract_strided_slice %379 {offsets = [0, 64], sizes = [2, 32], strides = [1, 1]} : vector<2x96xf32> to vector<2x32xf32>
    %397 = vector.extract_strided_slice %378 {offsets = [0, 64], sizes = [2, 32], strides = [1, 1]} : vector<2x96xf32> to vector<2x32xf32>
    %398 = arith.mulf %387, %397 : vector<2x32xf32>
    %399 = arith.addf %396, %398 : vector<2x32xf32>
    %400 = math.tanh %399 : vector<2x32xf32>
    %cst_67 = arith.constant 1.000000e+00 : f32
    %401 = vector.broadcast %cst_67 : f32 to vector<2x32xf32>
    %402 = arith.subf %401, %395 : vector<2x32xf32>
    %403 = arith.mulf %402, %400 : vector<2x32xf32>
    %404 = arith.mulf %395, %375 : vector<2x32xf32>
    %405 = arith.addf %403, %404 : vector<2x32xf32>
    %cst_68 = arith.constant dense<0.000000e+00> : vector<2x96xf32>
    %406 = tpu.matmul %405, %13, %cst_68 {dimension_numbers = #tpu.dot_dimension_numbers<[1], [0], [0], [1], [0, 0, 1, 1], [], []>} : vector<2x32xf32>, vector<32x96xf32>, vector<2x96xf32> -> vector<2x96xf32>
    %407 = vector.broadcast %14 : vector<1x96xf32> to vector<2x96xf32>
    %408 = arith.addf %406, %407 : vector<2x96xf32>
    %409 = vector.extract_strided_slice %12 {offsets = [26, 0], sizes = [2, 96], strides = [1, 1]} : vector<28x96xf32> to vector<2x96xf32>
    %410 = vector.extract_strided_slice %409 {offsets = [0, 0], sizes = [2, 32], strides = [1, 1]} : vector<2x96xf32> to vector<2x32xf32>
    %411 = vector.extract_strided_slice %408 {offsets = [0, 0], sizes = [2, 32], strides = [1, 1]} : vector<2x96xf32> to vector<2x32xf32>
    %412 = arith.addf %410, %411 : vector<2x32xf32>
    %413 = arith.negf %412 : vector<2x32xf32>
    %414 = math.exp %413 : vector<2x32xf32>
    %cst_69 = arith.constant 1.000000e+00 : f32
    %415 = vector.broadcast %cst_69 : f32 to vector<2x32xf32>
    %416 = arith.addf %415, %414 : vector<2x32xf32>
    %417 = arith.divf %415, %416 : vector<2x32xf32>
    %418 = vector.extract_strided_slice %409 {offsets = [0, 32], sizes = [2, 32], strides = [1, 1]} : vector<2x96xf32> to vector<2x32xf32>
    %419 = vector.extract_strided_slice %408 {offsets = [0, 32], sizes = [2, 32], strides = [1, 1]} : vector<2x96xf32> to vector<2x32xf32>
    %420 = arith.addf %418, %419 : vector<2x32xf32>
    %421 = arith.negf %420 : vector<2x32xf32>
    %422 = math.exp %421 : vector<2x32xf32>
    %cst_70 = arith.constant 1.000000e+00 : f32
    %423 = vector.broadcast %cst_70 : f32 to vector<2x32xf32>
    %424 = arith.addf %423, %422 : vector<2x32xf32>
    %425 = arith.divf %423, %424 : vector<2x32xf32>
    %426 = vector.extract_strided_slice %409 {offsets = [0, 64], sizes = [2, 32], strides = [1, 1]} : vector<2x96xf32> to vector<2x32xf32>
    %427 = vector.extract_strided_slice %408 {offsets = [0, 64], sizes = [2, 32], strides = [1, 1]} : vector<2x96xf32> to vector<2x32xf32>
    %428 = arith.mulf %417, %427 : vector<2x32xf32>
    %429 = arith.addf %426, %428 : vector<2x32xf32>
    %430 = math.tanh %429 : vector<2x32xf32>
    %cst_71 = arith.constant 1.000000e+00 : f32
    %431 = vector.broadcast %cst_71 : f32 to vector<2x32xf32>
    %432 = arith.subf %431, %425 : vector<2x32xf32>
    %433 = arith.mulf %432, %430 : vector<2x32xf32>
    %434 = arith.mulf %425, %405 : vector<2x32xf32>
    %435 = arith.addf %433, %434 : vector<2x32xf32>
    %436 = vector.extract_strided_slice %7 {offsets = [4, 0], sizes = [24, 16], strides = [1, 1]} : vector<28x16xf32> to vector<24x16xf32>
    %c0_72 = arith.constant 0 : index
    %c0_73 = arith.constant 0 : index
    %437 = vector.load %arg8[%c0_72, %c0_73] : memref<16x24xf32, #tpu.memory_space<vmem>>, vector<16x24xf32>
    %cst_74 = arith.constant dense<0.000000e+00> : vector<24x24xf32>
    %438 = tpu.matmul %436, %437, %cst_74 {dimension_numbers = #tpu.dot_dimension_numbers<[1], [0], [0], [1], [0, 0, 1, 1], [], []>} : vector<24x16xf32>, vector<16x24xf32>, vector<24x24xf32> -> vector<24x24xf32>
    %c0_75 = arith.constant 0 : index
    %c0_76 = arith.constant 0 : index
    %439 = vector.load %arg10[%c0_75, %c0_76] : memref<1x24xf32, #tpu.memory_space<vmem>>, vector<1x24xf32>
    %440 = vector.broadcast %439 : vector<1x24xf32> to vector<24x24xf32>
    %441 = arith.addf %438, %440 : vector<24x24xf32>
    %c0_77 = arith.constant 0 : index
    %c0_78 = arith.constant 0 : index
    %442 = vector.load %arg9[%c0_77, %c0_78] : memref<8x24xf32, #tpu.memory_space<vmem>>, vector<8x24xf32>
    %c0_79 = arith.constant 0 : index
    %c0_80 = arith.constant 0 : index
    %443 = vector.load %arg11[%c0_79, %c0_80] : memref<1x24xf32, #tpu.memory_space<vmem>>, vector<1x24xf32>
    %cst_81 = arith.constant 0.000000e+00 : f32
    %444 = vector.broadcast %cst_81 : f32 to vector<8x8xf32>
    %cst_82 = arith.constant dense<0.000000e+00> : vector<8x24xf32>
    %445 = tpu.matmul %444, %442, %cst_82 {dimension_numbers = #tpu.dot_dimension_numbers<[1], [0], [0], [1], [0, 0, 1, 1], [], []>} : vector<8x8xf32>, vector<8x24xf32>, vector<8x24xf32> -> vector<8x24xf32>
    %446 = vector.broadcast %443 : vector<1x24xf32> to vector<8x24xf32>
    %447 = arith.addf %445, %446 : vector<8x24xf32>
    %448 = vector.extract_strided_slice %441 {offsets = [0, 0], sizes = [8, 24], strides = [1, 1]} : vector<24x24xf32> to vector<8x24xf32>
    %449 = vector.extract_strided_slice %448 {offsets = [0, 0], sizes = [8, 8], strides = [1, 1]} : vector<8x24xf32> to vector<8x8xf32>
    %450 = vector.extract_strided_slice %447 {offsets = [0, 0], sizes = [8, 8], strides = [1, 1]} : vector<8x24xf32> to vector<8x8xf32>
    %451 = arith.addf %449, %450 : vector<8x8xf32>
    %452 = arith.negf %451 : vector<8x8xf32>
    %453 = math.exp %452 : vector<8x8xf32>
    %cst_83 = arith.constant 1.000000e+00 : f32
    %454 = vector.broadcast %cst_83 : f32 to vector<8x8xf32>
    %455 = arith.addf %454, %453 : vector<8x8xf32>
    %456 = arith.divf %454, %455 : vector<8x8xf32>
    %457 = vector.extract_strided_slice %448 {offsets = [0, 8], sizes = [8, 8], strides = [1, 1]} : vector<8x24xf32> to vector<8x8xf32>
    %458 = vector.extract_strided_slice %447 {offsets = [0, 8], sizes = [8, 8], strides = [1, 1]} : vector<8x24xf32> to vector<8x8xf32>
    %459 = arith.addf %457, %458 : vector<8x8xf32>
    %460 = arith.negf %459 : vector<8x8xf32>
    %461 = math.exp %460 : vector<8x8xf32>
    %cst_84 = arith.constant 1.000000e+00 : f32
    %462 = vector.broadcast %cst_84 : f32 to vector<8x8xf32>
    %463 = arith.addf %462, %461 : vector<8x8xf32>
    %464 = arith.divf %462, %463 : vector<8x8xf32>
    %465 = vector.extract_strided_slice %448 {offsets = [0, 16], sizes = [8, 8], strides = [1, 1]} : vector<8x24xf32> to vector<8x8xf32>
    %466 = vector.extract_strided_slice %447 {offsets = [0, 16], sizes = [8, 8], strides = [1, 1]} : vector<8x24xf32> to vector<8x8xf32>
    %467 = arith.mulf %456, %466 : vector<8x8xf32>
    %468 = arith.addf %465, %467 : vector<8x8xf32>
    %469 = math.tanh %468 : vector<8x8xf32>
    %cst_85 = arith.constant 1.000000e+00 : f32
    %470 = vector.broadcast %cst_85 : f32 to vector<8x8xf32>
    %471 = arith.subf %470, %464 : vector<8x8xf32>
    %472 = arith.mulf %471, %469 : vector<8x8xf32>
    %473 = arith.mulf %464, %444 : vector<8x8xf32>
    %474 = arith.addf %472, %473 : vector<8x8xf32>
    %cst_86 = arith.constant dense<0.000000e+00> : vector<8x24xf32>
    %475 = tpu.matmul %474, %442, %cst_86 {dimension_numbers = #tpu.dot_dimension_numbers<[1], [0], [0], [1], [0, 0, 1, 1], [], []>} : vector<8x8xf32>, vector<8x24xf32>, vector<8x24xf32> -> vector<8x24xf32>
    %476 = vector.broadcast %443 : vector<1x24xf32> to vector<8x24xf32>
    %477 = arith.addf %475, %476 : vector<8x24xf32>
    %478 = vector.extract_strided_slice %441 {offsets = [8, 0], sizes = [8, 24], strides = [1, 1]} : vector<24x24xf32> to vector<8x24xf32>
    %479 = vector.extract_strided_slice %478 {offsets = [0, 0], sizes = [8, 8], strides = [1, 1]} : vector<8x24xf32> to vector<8x8xf32>
    %480 = vector.extract_strided_slice %477 {offsets = [0, 0], sizes = [8, 8], strides = [1, 1]} : vector<8x24xf32> to vector<8x8xf32>
    %481 = arith.addf %479, %480 : vector<8x8xf32>
    %482 = arith.negf %481 : vector<8x8xf32>
    %483 = math.exp %482 : vector<8x8xf32>
    %cst_87 = arith.constant 1.000000e+00 : f32
    %484 = vector.broadcast %cst_87 : f32 to vector<8x8xf32>
    %485 = arith.addf %484, %483 : vector<8x8xf32>
    %486 = arith.divf %484, %485 : vector<8x8xf32>
    %487 = vector.extract_strided_slice %478 {offsets = [0, 8], sizes = [8, 8], strides = [1, 1]} : vector<8x24xf32> to vector<8x8xf32>
    %488 = vector.extract_strided_slice %477 {offsets = [0, 8], sizes = [8, 8], strides = [1, 1]} : vector<8x24xf32> to vector<8x8xf32>
    %489 = arith.addf %487, %488 : vector<8x8xf32>
    %490 = arith.negf %489 : vector<8x8xf32>
    %491 = math.exp %490 : vector<8x8xf32>
    %cst_88 = arith.constant 1.000000e+00 : f32
    %492 = vector.broadcast %cst_88 : f32 to vector<8x8xf32>
    %493 = arith.addf %492, %491 : vector<8x8xf32>
    %494 = arith.divf %492, %493 : vector<8x8xf32>
    %495 = vector.extract_strided_slice %478 {offsets = [0, 16], sizes = [8, 8], strides = [1, 1]} : vector<8x24xf32> to vector<8x8xf32>
    %496 = vector.extract_strided_slice %477 {offsets = [0, 16], sizes = [8, 8], strides = [1, 1]} : vector<8x24xf32> to vector<8x8xf32>
    %497 = arith.mulf %486, %496 : vector<8x8xf32>
    %498 = arith.addf %495, %497 : vector<8x8xf32>
    %499 = math.tanh %498 : vector<8x8xf32>
    %cst_89 = arith.constant 1.000000e+00 : f32
    %500 = vector.broadcast %cst_89 : f32 to vector<8x8xf32>
    %501 = arith.subf %500, %494 : vector<8x8xf32>
    %502 = arith.mulf %501, %499 : vector<8x8xf32>
    %503 = arith.mulf %494, %474 : vector<8x8xf32>
    %504 = arith.addf %502, %503 : vector<8x8xf32>
    %cst_90 = arith.constant dense<0.000000e+00> : vector<8x24xf32>
    %505 = tpu.matmul %504, %442, %cst_90 {dimension_numbers = #tpu.dot_dimension_numbers<[1], [0], [0], [1], [0, 0, 1, 1], [], []>} : vector<8x8xf32>, vector<8x24xf32>, vector<8x24xf32> -> vector<8x24xf32>
    %506 = vector.broadcast %443 : vector<1x24xf32> to vector<8x24xf32>
    %507 = arith.addf %505, %506 : vector<8x24xf32>
    %508 = vector.extract_strided_slice %441 {offsets = [16, 0], sizes = [8, 24], strides = [1, 1]} : vector<24x24xf32> to vector<8x24xf32>
    %509 = vector.extract_strided_slice %508 {offsets = [0, 0], sizes = [8, 8], strides = [1, 1]} : vector<8x24xf32> to vector<8x8xf32>
    %510 = vector.extract_strided_slice %507 {offsets = [0, 0], sizes = [8, 8], strides = [1, 1]} : vector<8x24xf32> to vector<8x8xf32>
    %511 = arith.addf %509, %510 : vector<8x8xf32>
    %512 = arith.negf %511 : vector<8x8xf32>
    %513 = math.exp %512 : vector<8x8xf32>
    %cst_91 = arith.constant 1.000000e+00 : f32
    %514 = vector.broadcast %cst_91 : f32 to vector<8x8xf32>
    %515 = arith.addf %514, %513 : vector<8x8xf32>
    %516 = arith.divf %514, %515 : vector<8x8xf32>
    %517 = vector.extract_strided_slice %508 {offsets = [0, 8], sizes = [8, 8], strides = [1, 1]} : vector<8x24xf32> to vector<8x8xf32>
    %518 = vector.extract_strided_slice %507 {offsets = [0, 8], sizes = [8, 8], strides = [1, 1]} : vector<8x24xf32> to vector<8x8xf32>
    %519 = arith.addf %517, %518 : vector<8x8xf32>
    %520 = arith.negf %519 : vector<8x8xf32>
    %521 = math.exp %520 : vector<8x8xf32>
    %cst_92 = arith.constant 1.000000e+00 : f32
    %522 = vector.broadcast %cst_92 : f32 to vector<8x8xf32>
    %523 = arith.addf %522, %521 : vector<8x8xf32>
    %524 = arith.divf %522, %523 : vector<8x8xf32>
    %525 = vector.extract_strided_slice %508 {offsets = [0, 16], sizes = [8, 8], strides = [1, 1]} : vector<8x24xf32> to vector<8x8xf32>
    %526 = vector.extract_strided_slice %507 {offsets = [0, 16], sizes = [8, 8], strides = [1, 1]} : vector<8x24xf32> to vector<8x8xf32>
    %527 = arith.mulf %516, %526 : vector<8x8xf32>
    %528 = arith.addf %525, %527 : vector<8x8xf32>
    %529 = math.tanh %528 : vector<8x8xf32>
    %cst_93 = arith.constant 1.000000e+00 : f32
    %530 = vector.broadcast %cst_93 : f32 to vector<8x8xf32>
    %531 = arith.subf %530, %524 : vector<8x8xf32>
    %532 = arith.mulf %531, %529 : vector<8x8xf32>
    %533 = arith.mulf %524, %504 : vector<8x8xf32>
    %534 = arith.addf %532, %533 : vector<8x8xf32>
    %535 = vector.extract_strided_slice %534 {offsets = [0, 0], sizes = [2, 8], strides = [1, 1]} : vector<8x8xf32> to vector<2x8xf32>
    %536 = vector.extract_strided_slice %534 {offsets = [2, 0], sizes = [2, 8], strides = [1, 1]} : vector<8x8xf32> to vector<2x8xf32>
    %537 = vector.extract_strided_slice %534 {offsets = [4, 0], sizes = [2, 8], strides = [1, 1]} : vector<8x8xf32> to vector<2x8xf32>
    %538 = vector.extract_strided_slice %534 {offsets = [6, 0], sizes = [2, 8], strides = [1, 1]} : vector<8x8xf32> to vector<2x8xf32>
    %539 = tpu.concatenate %435, %535, %536, %537, %538 in 1 : vector<2x32xf32>, vector<2x8xf32>, vector<2x8xf32>, vector<2x8xf32>, vector<2x8xf32> -> vector<2x64xf32>
    %c0_94 = arith.constant 0 : index
    %c0_95 = arith.constant 0 : index
    %540 = vector.load %arg12[%c0_94, %c0_95] : memref<64x4xf32, #tpu.memory_space<vmem>>, vector<64x4xf32>
    %cst_96 = arith.constant dense<0.000000e+00> : vector<2x4xf32>
    %541 = tpu.matmul %539, %540, %cst_96 {dimension_numbers = #tpu.dot_dimension_numbers<[1], [0], [0], [1], [0, 0, 1, 1], [], []>} : vector<2x64xf32>, vector<64x4xf32>, vector<2x4xf32> -> vector<2x4xf32>
    %c0_97 = arith.constant 0 : index
    %c0_98 = arith.constant 0 : index
    %542 = vector.load %arg13[%c0_97, %c0_98] : memref<1x4xf32, #tpu.memory_space<vmem>>, vector<1x4xf32>
    %543 = vector.broadcast %542 : vector<1x4xf32> to vector<2x4xf32>
    %544 = arith.addf %541, %543 : vector<2x4xf32>
    %c0_99 = arith.constant 0 : index
    %c0_100 = arith.constant 0 : index
    %545 = vector.load %arg1[%c0_99, %c0_100] : memref<2x16xf32, #tpu.memory_space<vmem>>, vector<2x16xf32>
    %c0_101 = arith.constant 0 : index
    %c0_102 = arith.constant 0 : index
    %546 = vector.load %arg14[%c0_101, %c0_102] : memref<16x4xf32, #tpu.memory_space<vmem>>, vector<16x4xf32>
    %cst_103 = arith.constant dense<0.000000e+00> : vector<2x4xf32>
    %547 = tpu.matmul %545, %546, %cst_103 {dimension_numbers = #tpu.dot_dimension_numbers<[1], [0], [0], [1], [0, 0, 1, 1], [], []>} : vector<2x16xf32>, vector<16x4xf32>, vector<2x4xf32> -> vector<2x4xf32>
    %548 = arith.addf %544, %547 : vector<2x4xf32>
    %c0_104 = arith.constant 0 : index
    %c0_105 = arith.constant 0 : index
    %549 = vector.load %arg15[%c0_104, %c0_105] : memref<1x4xf32, #tpu.memory_space<vmem>>, vector<1x4xf32>
    %550 = vector.broadcast %549 : vector<1x4xf32> to vector<2x4xf32>
    %551 = arith.addf %548, %550 : vector<2x4xf32>
    %552 = arith.negf %551 : vector<2x4xf32>
    %553 = math.exp %552 : vector<2x4xf32>
    %cst_106 = arith.constant 1.000000e+00 : f32
    %554 = vector.broadcast %cst_106 : f32 to vector<2x4xf32>
    %555 = arith.addf %554, %553 : vector<2x4xf32>
    %556 = arith.divf %554, %555 : vector<2x4xf32>
    %c0_107 = arith.constant 0 : index
    %c0_108 = arith.constant 0 : index
    %557 = vector.load %arg16[%c0_107, %c0_108] : memref<2x4xf32, #tpu.memory_space<vmem>>, vector<2x4xf32>
    tpu.vector_store %arg16[%c0_107, %c0_108], %556 {strides = array<i32>} : memref<2x4xf32, #tpu.memory_space<vmem>>, vector<2x4xf32>,
    return
  }
}

</mosaic_0001>

<bundles_post_ra>
// kernel: tpu_custom_call.1
= control target key start
LH: loop header
LB: loop body
LE: loop exit
PB: predicated region body
PF: predicated region fallthrough
CT: control target
= control target key end

     0   :  { %s3492_s0 = inlined_call_operand.vmem [shape: f32[28,12], index: 0, kind: input, shape index: {}]   ;;  %s3493_s1 = inlined_call_operand.vmem [shape: f32[2,16], index: 1, kind: input, shape index: {}]   ;;  %s3494_s2 = inlined_call_operand.vmem [shape: f32[12,16], index: 2, kind: input, shape index: {}]   ;;  %s3495_s3 = inlined_call_operand.vmem [shape: f32[1,16], index: 3, kind: input, shape index: {}]   ;;  %s3496_s4 = inlined_call_operand.vmem [shape: f32[16,96], index: 4, kind: input, shape index: {}]   ;;  %s3497_s5 = inlined_call_operand.vmem [shape: f32[32,96], index: 5, kind: input, shape index: {}]   ;;  %s3498_s6 = inlined_call_operand.vmem [shape: f32[1,96], index: 6, kind: input, shape index: {}]   ;;  %s3499_s7 = inlined_call_operand.vmem [shape: f32[1,96], index: 7, kind: input, shape index: {}]   ;;  %s3500_s8 = inlined_call_operand.vmem [shape: f32[16,24], index: 8, kind: input, shape index: {}]   ;;  %s3501_s9 = inlined_call_operand.vmem [shape: f32[8,24], index: 9, kind: input, shape index: {}]   ;;  %s3502_s10 = inlined_call_operand.vmem [shape: f32[1,24], index: 10, kind: input, shape index: {}]   ;;  %s3503_s11 = inlined_call_operand.vmem [shape: f32[1,24], index: 11, kind: input, shape index: {}]   ;;  %s3504_s12 = inlined_call_operand.vmem [shape: f32[64,4], index: 12, kind: input, shape index: {}]   ;;  %s3505_s13 = inlined_call_operand.vmem [shape: f32[1,4], index: 13, kind: input, shape index: {}]   ;;  %s3506_s14 = inlined_call_operand.vmem [shape: f32[16,4], index: 14, kind: input, shape index: {}]   ;;  %s3507_s15 = inlined_call_operand.vmem [shape: f32[1,4], index: 15, kind: input, shape index: {}]   ;;  %s3508_s16 = inlined_call_operand.hbm [shape: f32[2,4], index: 16, kind: output, shape index: {}]  }
   0x1   :  { %3510 = sst [smem:[#allocation5_spill]] %s3492_s0 }
   0x2   :  { %v59_v0 = vld [vmem:[%s3494_s2 + $0x8] sm:$0xf]  ;;  %vm80_vm0 = vcmask 1043456   ;;  %v58_v1 = vld [vmem:[%s3494_s2] sm:$0xff]  ;;  %s3511_s27 = sld [smem:[#allocation5_spill]]  ;;  %vm67_vm1 = vcmask 97280  }
   0x3   :  { %2550 = vmatprep.subr.msk.mxu0 %vm80_vm0, %v59_v0  ;;  %v3037_v5 = vld [vmem:[%s3497_s5 + $0x18] sm:$0xff] }
   0x4   :  { %2551 = vmatpush3.msk.msra.mxu0 %vm80_vm0, %v59_v0 }
   0x5   :  { %2552 = vmatprep.subr.mxu0 %v58_v1 }
   0x8   :  { %v54_v2 = vld [vmem:[%s3511_s27] sm:$0xff]  ;;  %v55_v3 = vld [vmem:[%s3511_s27 + $0x8] sm:$0xff]  ;;  %v56_v4 = vld [vmem:[%s3511_s27 + $0x10] sm:$0xff] }
   0x9   :  { %2554 = vmatprep.mubr.msk.f32.mxu0 %vm67_vm1, %v54_v2 }
   0xa   :  { %21 = vsyncpa [#allocation3], 0  ;;  %2553 = vmatpush3.msra.mxu0 %v58_v1  ;;  %v2919_v6 = vmov 0.0   ;;  %v3044_v7 = vld [vmem:[%s3497_s5 + $0x10] sm:$0xff]  ;;  %v57_v8 = vld [vmem:[%s3511_s27 + $0x18] sm:$0xf] }
   0xb   :  { %2555 = vmatmul.mubr.msk.f32.vlgmr.msra.gmra.mxu0 %vm67_vm1, %v55_v3  ;;  %2570 = vmatprep.subr.mxu0 %v2919_v6  ;;  %v3055_v9 = vld [vmem:[%s3497_s5 + $0x8] sm:$0xff]  ;;  %v3063_v10 = vld [vmem:[%s3497_s5] sm:$0xff]  ;;  %vm2920_vm2 = vmmov 0   ;;  %vm182_vm3 = vcmask 130048   ;;  %vm291_vm4 = vcmask 261120   ;;  %s2923_s25 = smov 112  }
   0xc   :  { %2557 = vmatprep.mubr.msk.f32.mxu0 %vm67_vm1, %v56_v4  ;;  %2571 = vmatpush3.msra.mxu0 %v3037_v5  ;;  %v174_v11 = vld [vmem:[%s3496_s4 + $0x8] sm:$0xff]  ;;  %v173_v12 = vld [vmem:[%s3496_s4] sm:$0xff]  ;;  %s2924_s5 = smov 16   ;;  %vm1866_vm5 = vcmask 64512   ;;  %s2928_s26 = smov 48   ;;  %vm2188_vm6 = vcmask 326656  }
   0xd   :  { %2572 = vmatprep.subr.mxu0 %v2919_v6  ;;  %2560 = vmatprep.subr.mxu1 %v174_v11  ;;  %v2391_v13 = vld [vmem:[%s3495_s3] ss:$0 sm:$0xff]  ;;  %s2921_s3 = smov 64   ;;  %vm2190_vm7 = vcmask 392192   ;;  %vm2192_vm8 = vcmask 457728   ;;  %vm2211_vm9 = vcmask 523264  }
   0xe   :  { %2573 = vmatpush3.msra.mxu0 %v3044_v7  ;;  %2561 = vmatpush3.msra.mxu1 %v174_v11  ;;  %v3095_v23 = vld [vmem:[%s3499_s7] ss:$0 sm:$0xff]  ;;  %s2930_s29 = smov [#allocation2]   ;;  %vm2375_vm10 = vcmask 25600  }
   0xf   :  { %2558 = vmatmul.mubr.msk.f32.gmra.mxu0 %vm67_vm1, %v57_v8  ;;  %2574 = vmatprep.subr.mxu0 %v2919_v6  ;;  %v3125_v37 = vld [vmem:[%s3498_s6] ss:$0 sm:$0xff]  ;;  %s2922_s6 = smov 96   ;;  %s2383_s30 = sshll.u32 %s2930_s29, 4  ;;  %s2384_s30 = int_to_ptr.vmem [resolvable:$true] %s2383_s30 }
  0x10   :  { %2575 = vmatpush3.msra.mxu0 %v3055_v9  ;;  %2578 = vmatprep.mubr.msk.f32.mxu0 %vm2920_vm2, %v2919_v6  ;;  %p2902_p1 = scmp.lt.s32.totalorder %s2384_s30, %s2384_s30 }
  0x11   :  { %2576 = vmatprep.subr.mxu0 %v2919_v6  ;;  %2562 = vmatprep.subr.mxu1 %v173_v12 }
  0x12   :  { %2577 = vmatpush3.msra.mxu0 %v3063_v10  ;;  %2563 = vmatpush3.msra.mxu1 %v173_v12 }
  0x13   :  { %2579 = vmatmul.mubr.f32.vlgmr.msra.gmra.mxu0 %v2919_v6  ;;  %2592 = vmatprep.subr.mxu0 %v2919_v6 }
  0x14   :  { %2593 = vmatpush3.msra.mxu0 %v3037_v5  ;;  %2600 = vmatprep.mubr.msk.f32.mxu0 %vm2920_vm2, %v2919_v6 }
  0x15   :  { %2594 = vmatprep.subr.mxu0 %v2919_v6  ;;  %2581 = vmatprep.subr.mxu1 %v2919_v6 }
  0x16   :  { %2595 = vmatpush3.msra.mxu0 %v3044_v7 }
  0x17   :  { %2596 = vmatprep.subr.mxu0 %v2919_v6 }
  0x18   :  { %2597 = vmatpush3.msra.mxu0 %v3055_v9 }
  0x19   :  { %2598 = vmatprep.subr.mxu0 %v2919_v6 }
  0x1a   :  { %2599 = vmatpush3.msra.mxu0 %v3063_v10 }
  0x1b   :  { %2614 = vmatprep.subr.mxu0 %v2919_v6 }
  0xcb   :  { %v2556_v14 = vpop.f32.mrf.mxu0 }
  0xcc   :  { %v156_v15 = vadd.f32 %v2556_v14, %v2391_v13 }
  0xcd   :  { %v150_v16 = vpop.f32.mrf.mxu0 }
  0xce   :  { %v170_v17 = vmax.f32 %v156_v15, 0.0  ;;  %v151_v18 = vadd.f32 %v2391_v13, %v150_v16 }
  0xcf   :  { %v2559_v19 = vpop.f32.mrf.mxu0 }
  0xd0   :  { %v169_v20 = vmax.f32 %v151_v18, 0.0  ;;  %v166_v21 = vadd.f32 %v2559_v19, %v2391_v13  ;;  %v1766_v24 = vrot.slane %v170_v17, 4 }
  0xd1   :  { %v160_v22 = vpop.f32.mrf.mxu0 }
  0xd2   :  { %v1765_v25 = vrot.slane %v169_v20, 4  ;;  %v172_v26 = vmax.f32 %v166_v21, 0.0  ;;  %v161_v27 = vadd.f32 %v2391_v13, %v160_v22  ;;  %2564 = vmatprep.mubr.msk.f32.mxu1 %vm182_vm3, %v169_v20 }
  0xd3   :  { %2565 = vmatmul.mubr.msk.f32.vlgmr.msra.gmra.mxu1 %vm182_vm3, %v170_v17  ;;  %v361_v28 = vpop.f32.mrf.mxu0 }
  0xd4   :  { %v1770_v29 = vrot.slane %v172_v26, 4  ;;  %v171_v30 = vmax.f32 %v161_v27, 0.0  ;;  %v362_v31 = vadd.f32 %v3095_v23, %v361_v28  ;;  %2582 = vmatpush3.msra.mxu1 %v3037_v5  ;;  %v3102_v32 = vsel %vm80_vm0, %v1765_v25, %v1766_v24 }
  0xd5   :  { %v2580_v33 = vpop.f32.mrf.mxu0  ;;  %2583 = vmatprep.subr.mxu1 %v2919_v6 }
  0xd6   :  { %v1768_v34 = vrot.slane %v171_v30, 4  ;;  %2567 = vmatprep.mubr.msk.f32.mxu1 %vm182_vm3, %v171_v30  ;;  %373 = vrot.lane.b32.xlu0 %v362_v31, %s2921_s3 }
  0xd7   :  { %2568 = vmatmul.mubr.msk.f32.gmra.mxu1 %vm182_vm3, %v172_v26 }
  0xd8   :  { %2584 = vmatpush3.msra.mxu1 %v3044_v7  ;;  %2589 = vmatprep.mubr.msk.f32.mxu1 %vm2920_vm2, %v2919_v6  ;;  %v3112_v35 = vsel %vm80_vm0, %v1766_v24, %v1768_v34  ;;  %v3115_v36 = vsel %vm80_vm0, %v1768_v34, %v1770_v29 }
  0xd9   :  { %2585 = vmatprep.subr.mxu1 %v2919_v6 }
  0xda   :  { %2586 = vmatpush3.msra.mxu1 %v3055_v9 }
  0xdb   :  { %2587 = vmatprep.subr.mxu1 %v2919_v6 }
  0xdc   :  { %2588 = vmatpush3.msra.mxu1 %v3063_v10 }
  0xdd   :  { %2603 = vmatprep.subr.mxu1 %v2919_v6 }
 0x148   :  { %v374_v48 = vpop.permute.xlu0 %373 }
 0x193   :  { %v2566_v38 = vpop.f32.mrf.mxu1 }
 0x194   :  { %v3128_v39 = vadd.f32 %v2566_v38, %v3125_v37 }
 0x195   :  { %v261_v40 = vpop.f32.mrf.mxu1 }
 0x196   :  { %v3131_v41 = vadd.f32 %v3125_v37, %v261_v40 }
 0x197   :  { %v2569_v42 = vpop.f32.mrf.mxu1 }
 0x198   :  { %v365_v43 = vadd.f32 %v362_v31, %v3131_v41  ;;  %v3135_v44 = vadd.f32 %v2569_v42, %v3125_v37 }
 0x199   :  { %v3152_v60 = vpop.f32.mrf.mxu1 }
 0x19a   :  { %v2403_v45 = vmul.f32 -1.442695, %v365_v43 }
 0x19c   :  { %2790 = vpow2.f32 %v2403_v45 }
 0x1a9   :  { %v2791_v46 = vpop.eup %2790 }
 0x1aa   :  { %v369_v47 = vadd.f32 1.0, %v2791_v46 }
 0x1ac   :  { %2792 = vrcp.f32 %v369_v47 }
 0x1b9   :  { %v2793_v49 = vpop.eup %2792 }
 0x1ba   :  { %v376_v50 = vmul.f32 %v2793_v49, %v374_v48  ;;  %v383_v54 = vsub.f32 1.0, %v2793_v49  ;;  %v389_v56 = vmul.f32 0.0, %v2793_v49 }
 0x1bc   :  { %378 = vrot.lane.b32.xlu0 %v376_v50, %s2921_s3 }
 0x22e   :  { %v379_v51 = vpop.permute.xlu0 %378 }
 0x22f   :  { %v381_v52 = vadd.f32 %v379_v51, %v3131_v41 }
 0x231   :  { %2794 = vtanh.f32 %v381_v52 }
 0x23e   :  { %v2795_v53 = vpop.eup %2794 }
 0x23f   :  { %385 = vrot.lane.b32.xlu1 %v2795_v53, %s2922_s6 }
 0x2b1   :  { %v386_v55 = vpop.permute.xlu1 %385 }
 0x2b2   :  { %v388_v57 = vmul.f32 %v386_v55, %v383_v54 }
 0x2b4   :  { %v390_v58 = vadd.f32 %v389_v56, %v388_v57 }
 0x2b6   :  { %392 = vrot.lane.b32.xlu1 %v390_v58, %s2922_s6  ;;  %v492_v16 = vrot.slane %v390_v58, 6 }
 0x328   :  { %v393_v59 = vpop.permute.xlu1 %392 }
 0x329   :  { %2590 = vmatmul.mubr.msk.f32.vlgmr.msra.gmra.mxu1 %vm291_vm4, %v393_v59 }
 0x32a   :  { %2604 = vmatpush3.msra.mxu1 %v3037_v5  ;;  %2611 = vmatprep.mubr.msk.f32.mxu1 %vm2920_vm2, %v2919_v6 }
 0x32b   :  { %2605 = vmatprep.subr.mxu1 %v2919_v6 }
 0x32c   :  { %2606 = vmatpush3.msra.mxu1 %v3044_v7 }
 0x32d   :  { %2607 = vmatprep.subr.mxu1 %v2919_v6 }
 0x32e   :  { %2608 = vmatpush3.msra.mxu1 %v3055_v9 }
 0x32f   :  { %2609 = vmatprep.subr.mxu1 %v2919_v6 }
 0x330   :  { %2610 = vmatpush3.msra.mxu1 %v3063_v10 }
 0x331   :  { %2625 = vmatprep.subr.mxu1 %v2919_v6 }
 0x3e9   :  { %v462_v61 = vpop.f32.mrf.mxu1 }
 0x3ea   :  { %v463_v62 = vadd.f32 %v3095_v23, %v462_v61 }
 0x3eb   :  { %v2591_v63 = vpop.f32.mrf.mxu1 }
 0x3ec   :  { %v467_v0 = vrot.slane %v463_v62, 6 }
 0x3ee   :  { %476 = vrot.lane.b32.xlu0 %v467_v0, %s2921_s3  ;;  %v469_v1 = vadd.f32 %v467_v0, %v3131_v41 }
 0x3f0   :  { %v2405_v2 = vmul.f32 -1.442695, %v469_v1 }
 0x3f2   :  { %2796 = vpow2.f32 %v2405_v2 }
 0x3ff   :  { %v2797_v3 = vpop.eup %2796 }
 0x400   :  { %v473_v4 = vadd.f32 1.0, %v2797_v3 }
 0x402   :  { %2798 = vrcp.f32 %v473_v4 }
 0x40f   :  { %v2799_v8 = vpop.eup %2798 }
 0x410   :  { %v486_v17 = vsub.f32 1.0, %v2799_v8  ;;  %v494_v20 = vmul.f32 %v2799_v8, %v492_v16 }
 0x460   :  { %v477_v11 = vpop.permute.xlu0 %476 }
 0x461   :  { %v479_v12 = vmul.f32 %v2799_v8, %v477_v11 }
 0x463   :  { %481 = vrot.lane.b32.xlu1 %v479_v12, %s2921_s3 }
 0x4d5   :  { %v482_v13 = vpop.permute.xlu1 %481 }
 0x4d6   :  { %v484_v14 = vadd.f32 %v482_v13, %v3131_v41 }
 0x4d8   :  { %2800 = vtanh.f32 %v484_v14 }
 0x4e5   :  { %v2801_v15 = vpop.eup %2800 }
 0x4e6   :  { %488 = vrot.lane.b32.xlu0 %v2801_v15, %s2922_s6 }
 0x558   :  { %v489_v18 = vpop.permute.xlu0 %488 }
 0x559   :  { %v491_v19 = vmul.f32 %v489_v18, %v486_v17 }
 0x55b   :  { %v495_v21 = vadd.f32 %v494_v20, %v491_v19 }
 0x55d   :  { %v497_v22 = vrot.slane %v495_v21, 2  ;;  %v598_v46 = vrot.slane %v495_v21, 6 }
 0x55f   :  { %498 = vrot.lane.b32.xlu1 %v497_v22, %s2922_s6 }
 0x5d1   :  { %v499_v24 = vpop.permute.xlu1 %498 }
 0x5d2   :  { %2601 = vmatmul.mubr.msk.f32.vlgmr.msra.gmra.mxu0 %vm291_vm4, %v499_v24 }
 0x5d3   :  { %2615 = vmatpush3.msra.mxu0 %v3037_v5  ;;  %2622 = vmatprep.mubr.msk.f32.mxu0 %vm2920_vm2, %v2919_v6 }
 0x5d4   :  { %2616 = vmatprep.subr.mxu0 %v2919_v6 }
 0x5d5   :  { %2617 = vmatpush3.msra.mxu0 %v3044_v7 }
 0x5d6   :  { %2618 = vmatprep.subr.mxu0 %v2919_v6 }
 0x5d7   :  { %2619 = vmatpush3.msra.mxu0 %v3055_v9 }
 0x5d8   :  { %2620 = vmatprep.subr.mxu0 %v2919_v6 }
 0x5d9   :  { %2621 = vmatpush3.msra.mxu0 %v3063_v10 }
 0x5da   :  { %2636 = vmatprep.subr.mxu0 %v2919_v6 }
 0x692   :  { %v568_v25 = vpop.f32.mrf.mxu0 }
 0x693   :  { %v569_v26 = vadd.f32 %v3095_v23, %v568_v25 }
 0x694   :  { %v2602_v27 = vpop.f32.mrf.mxu0 }
 0x695   :  { %v573_v28 = vrot.slane %v569_v26, 4 }
 0x697   :  { %582 = vrot.lane.b32.xlu0 %v573_v28, %s2921_s3  ;;  %v575_v29 = vadd.f32 %v573_v28, %v3131_v41 }
 0x699   :  { %v2407_v30 = vmul.f32 -1.442695, %v575_v29 }
 0x69b   :  { %2802 = vpow2.f32 %v2407_v30 }
 0x6a8   :  { %v2803_v31 = vpop.eup %2802 }
 0x6a9   :  { %v579_v33 = vadd.f32 1.0, %v2803_v31 }
 0x6ab   :  { %2804 = vrcp.f32 %v579_v33 }
 0x6b8   :  { %v2805_v34 = vpop.eup %2804 }
 0x6b9   :  { %v592_v47 = vsub.f32 1.0, %v2805_v34  ;;  %v600_v49 = vmul.f32 %v2805_v34, %v598_v46 }
 0x709   :  { %v583_v38 = vpop.permute.xlu0 %582 }
 0x70a   :  { %v585_v40 = vmul.f32 %v2805_v34, %v583_v38 }
 0x70c   :  { %587 = vrot.lane.b32.xlu1 %v585_v40, %s2921_s3 }
 0x77e   :  { %v588_v42 = vpop.permute.xlu1 %587 }
 0x77f   :  { %v590_v43 = vadd.f32 %v588_v42, %v3131_v41 }
 0x781   :  { %2806 = vtanh.f32 %v590_v43 }
 0x78e   :  { %v2807_v45 = vpop.eup %2806 }
 0x78f   :  { %594 = vrot.lane.b32.xlu0 %v2807_v45, %s2922_s6 }
 0x801   :  { %v595_v48 = vpop.permute.xlu0 %594 }
 0x802   :  { %v597_v50 = vmul.f32 %v595_v48, %v592_v47 }
 0x804   :  { %v601_v51 = vadd.f32 %v600_v49, %v597_v50 }
 0x806   :  { %v603_v52 = vrot.slane %v601_v51, 4  ;;  %v704_v8 = vrot.slane %v601_v51, 6 }
 0x808   :  { %604 = vrot.lane.b32.xlu1 %v603_v52, %s2922_s6 }
 0x87a   :  { %v605_v53 = vpop.permute.xlu1 %604 }
 0x87b   :  { %2612 = vmatmul.mubr.msk.f32.vlgmr.msra.gmra.mxu1 %vm291_vm4, %v605_v53 }
 0x87c   :  { %2626 = vmatpush3.msra.mxu1 %v3037_v5  ;;  %2633 = vmatprep.mubr.msk.f32.mxu1 %vm2920_vm2, %v2919_v6 }
 0x87d   :  { %2627 = vmatprep.subr.mxu1 %v2919_v6 }
 0x87e   :  { %2628 = vmatpush3.msra.mxu1 %v3044_v7 }
 0x87f   :  { %2629 = vmatprep.subr.mxu1 %v2919_v6 }
 0x880   :  { %2630 = vmatpush3.msra.mxu1 %v3055_v9 }
 0x881   :  { %2631 = vmatprep.subr.mxu1 %v2919_v6 }
 0x882   :  { %2632 = vmatpush3.msra.mxu1 %v3063_v10 }
 0x883   :  { %2647 = vmatprep.subr.mxu1 %v2919_v6 }
 0x93b   :  { %v674_v54 = vpop.f32.mrf.mxu1 }
 0x93c   :  { %v675_v55 = vadd.f32 %v3095_v23, %v674_v54 }
 0x93d   :  { %v2613_v56 = vpop.f32.mrf.mxu1 }
 0x93e   :  { %v679_v57 = vrot.slane %v675_v55, 2 }
 0x940   :  { %688 = vrot.lane.b32.xlu0 %v679_v57, %s2921_s3  ;;  %v681_v58 = vadd.f32 %v679_v57, %v3131_v41 }
 0x942   :  { %v2409_v59 = vmul.f32 -1.442695, %v681_v58 }
 0x944   :  { %2808 = vpow2.f32 %v2409_v59 }
 0x951   :  { %v2809_v61 = vpop.eup %2808 }
 0x952   :  { %v685_v62 = vadd.f32 1.0, %v2809_v61 }
 0x954   :  { %2810 = vrcp.f32 %v685_v62 }
 0x961   :  { %v2811_v63 = vpop.eup %2810 }
 0x962   :  { %v698_v11 = vsub.f32 1.0, %v2811_v63  ;;  %v706_v13 = vmul.f32 %v2811_v63, %v704_v8 }
 0x9b2   :  { %v689_v0 = vpop.permute.xlu0 %688 }
 0x9b3   :  { %v691_v1 = vmul.f32 %v2811_v63, %v689_v0 }
 0x9b5   :  { %693 = vrot.lane.b32.xlu1 %v691_v1, %s2921_s3 }
 0xa27   :  { %v694_v2 = vpop.permute.xlu1 %693 }
 0xa28   :  { %v696_v3 = vadd.f32 %v694_v2, %v3131_v41 }
 0xa2a   :  { %2812 = vtanh.f32 %v696_v3 }
 0xa37   :  { %v2813_v4 = vpop.eup %2812 }
 0xa38   :  { %700 = vrot.lane.b32.xlu0 %v2813_v4, %s2922_s6 }
 0xaaa   :  { %v701_v12 = vpop.permute.xlu0 %700 }
 0xaab   :  { %v703_v14 = vmul.f32 %v701_v12, %v698_v11 }
 0xaad   :  { %v707_v15 = vadd.f32 %v706_v13, %v703_v14 }
 0xaaf   :  { %v709_v16 = vrot.slane %v707_v15, 6 }
 0xab1   :  { %710 = vrot.lane.b32.xlu1 %v709_v16, %s2922_s6 }
 0xb23   :  { %v711_v17 = vpop.permute.xlu1 %710 }
 0xb24   :  { %2623 = vmatmul.mubr.msk.f32.vlgmr.msra.gmra.mxu0 %vm291_vm4, %v711_v17 }
 0xb25   :  { %2637 = vmatpush3.msra.mxu0 %v3037_v5  ;;  %2644 = vmatprep.mubr.msk.f32.mxu0 %vm2920_vm2, %v2919_v6 }
 0xb26   :  { %2638 = vmatprep.subr.mxu0 %v2919_v6 }
 0xb27   :  { %2639 = vmatpush3.msra.mxu0 %v3044_v7 }
 0xb28   :  { %2640 = vmatprep.subr.mxu0 %v2919_v6 }
 0xb29   :  { %2641 = vmatpush3.msra.mxu0 %v3055_v9 }
 0xb2a   :  { %2642 = vmatprep.subr.mxu0 %v2919_v6 }
 0xb2b   :  { %2643 = vmatpush3.msra.mxu0 %v3063_v10 }
 0xb2c   :  { %2658 = vmatprep.subr.mxu0 %v2919_v6 }
 0xbe4   :  { %v780_v41 = vpop.f32.mrf.mxu0 }
 0xbe5   :  { %v781_v18 = vadd.f32 %v3095_v23, %v780_v41 }
 0xbe6   :  { %v2624_v19 = vpop.f32.mrf.mxu0 }
 0xbe7   :  { %792 = vrot.lane.b32.xlu0 %v781_v18, %s2921_s3  ;;  %v784_v20 = vadd.f32 %v781_v18, %v3128_v39 }
 0xbe9   :  { %v2411_v21 = vmul.f32 -1.442695, %v784_v20 }
 0xbeb   :  { %2814 = vpow2.f32 %v2411_v21 }
 0xbf8   :  { %v2815_v22 = vpop.eup %2814 }
 0xbf9   :  { %v788_v24 = vadd.f32 1.0, %v2815_v22 }
 0xbfb   :  { %2816 = vrcp.f32 %v788_v24 }
 0xc08   :  { %v2817_v25 = vpop.eup %2816 }
 0xc09   :  { %v802_v31 = vsub.f32 1.0, %v2817_v25  ;;  %v809_v34 = vmul.f32 %v2817_v25, %v709_v16 }
 0xc59   :  { %v793_v26 = vpop.permute.xlu0 %792 }
 0xc5a   :  { %v795_v27 = vmul.f32 %v2817_v25, %v793_v26 }
 0xc5c   :  { %797 = vrot.lane.b32.xlu1 %v795_v27, %s2921_s3 }
 0xcce   :  { %v798_v28 = vpop.permute.xlu1 %797 }
 0xccf   :  { %v800_v29 = vadd.f32 %v798_v28, %v3128_v39 }
 0xcd1   :  { %2818 = vtanh.f32 %v800_v29 }
 0xcde   :  { %v2819_v30 = vpop.eup %2818 }
 0xcdf   :  { %804 = vrot.lane.b32.xlu0 %v2819_v30, %s2922_s6 }
 0xd51   :  { %v805_v33 = vpop.permute.xlu0 %804 }
 0xd52   :  { %v807_v38 = vmul.f32 %v805_v33, %v802_v31 }
 0xd54   :  { %v810_v40 = vadd.f32 %v809_v34, %v807_v38 }
 0xd56   :  { %812 = vrot.lane.b32.xlu1 %v810_v40, %s2922_s6  ;;  %v912_v58 = vrot.slane %v810_v40, 6 }
 0xdc8   :  { %v813_v42 = vpop.permute.xlu1 %812 }
 0xdc9   :  { %2634 = vmatmul.mubr.msk.f32.vlgmr.msra.gmra.mxu1 %vm291_vm4, %v813_v42 }
 0xdca   :  { %2648 = vmatpush3.msra.mxu1 %v3037_v5  ;;  %2655 = vmatprep.mubr.msk.f32.mxu1 %vm2920_vm2, %v2919_v6 }
 0xdcb   :  { %2649 = vmatprep.subr.mxu1 %v2919_v6 }
 0xdcc   :  { %2650 = vmatpush3.msra.mxu1 %v3044_v7 }
 0xdcd   :  { %2651 = vmatprep.subr.mxu1 %v2919_v6 }
 0xdce   :  { %2652 = vmatpush3.msra.mxu1 %v3055_v9 }
 0xdcf   :  { %2653 = vmatprep.subr.mxu1 %v2919_v6 }
 0xdd0   :  { %2654 = vmatpush3.msra.mxu1 %v3063_v10 }
 0xdd1   :  { %2669 = vmatprep.subr.mxu1 %v2919_v6 }
 0xe89   :  { %v882_v43 = vpop.f32.mrf.mxu1 }
 0xe8a   :  { %v883_v45 = vadd.f32 %v3095_v23, %v882_v43 }
 0xe8b   :  { %v2635_v46 = vpop.f32.mrf.mxu1 }
 0xe8c   :  { %v887_v47 = vrot.slane %v883_v45, 6 }
 0xe8e   :  { %896 = vrot.lane.b32.xlu0 %v887_v47, %s2921_s3  ;;  %v889_v48 = vadd.f32 %v887_v47, %v3128_v39 }
 0xe90   :  { %v2413_v49 = vmul.f32 -1.442695, %v889_v48 }
 0xe92   :  { %2820 = vpow2.f32 %v2413_v49 }
 0xe9f   :  { %v2821_v50 = vpop.eup %2820 }
 0xea0   :  { %v893_v51 = vadd.f32 1.0, %v2821_v50 }
 0xea2   :  { %2822 = vrcp.f32 %v893_v51 }
 0xeaf   :  { %v2823_v52 = vpop.eup %2822 }
 0xeb0   :  { %v906_v59 = vsub.f32 1.0, %v2823_v52  ;;  %v914_v63 = vmul.f32 %v2823_v52, %v912_v58 }
 0xf00   :  { %v897_v53 = vpop.permute.xlu0 %896 }
 0xf01   :  { %v899_v54 = vmul.f32 %v2823_v52, %v897_v53 }
 0xf03   :  { %901 = vrot.lane.b32.xlu1 %v899_v54, %s2921_s3 }
 0xf75   :  { %v902_v55 = vpop.permute.xlu1 %901 }
 0xf76   :  { %v904_v56 = vadd.f32 %v902_v55, %v3128_v39 }
 0xf78   :  { %2824 = vtanh.f32 %v904_v56 }
 0xf85   :  { %v2825_v57 = vpop.eup %2824 }
 0xf86   :  { %908 = vrot.lane.b32.xlu0 %v2825_v57, %s2922_s6 }
 0xff8   :  { %v909_v61 = vpop.permute.xlu0 %908 }
 0xff9   :  { %v911_v62 = vmul.f32 %v909_v61, %v906_v59 }
 0xffb   :  { %v915_v0 = vadd.f32 %v914_v63, %v911_v62  ;;  %v3284_v62 = vadd.f32 %v3125_v37, %v3152_v60 }
 0xffd   :  { %v917_v1 = vrot.slane %v915_v0, 2  ;;  %v1018_v21 = vrot.slane %v915_v0, 6 }
 0xfff   :  { %918 = vrot.lane.b32.xlu1 %v917_v1, %s2922_s6 }
0x1071   :  { %v919_v2 = vpop.permute.xlu1 %918 }
0x1072   :  { %2645 = vmatmul.mubr.msk.f32.vlgmr.msra.gmra.mxu0 %vm291_vm4, %v919_v2 }
0x1073   :  { %2659 = vmatpush3.msra.mxu0 %v3037_v5  ;;  %2666 = vmatprep.mubr.msk.f32.mxu0 %vm2920_vm2, %v2919_v6 }
0x1074   :  { %2660 = vmatprep.subr.mxu0 %v2919_v6 }
0x1075   :  { %2661 = vmatpush3.msra.mxu0 %v3044_v7 }
0x1076   :  { %2662 = vmatprep.subr.mxu0 %v2919_v6 }
0x1077   :  { %2663 = vmatpush3.msra.mxu0 %v3055_v9 }
0x1078   :  { %2664 = vmatprep.subr.mxu0 %v2919_v6 }
0x1079   :  { %2665 = vmatpush3.msra.mxu0 %v3063_v10 }
0x107a   :  { %2680 = vmatprep.subr.mxu0 %v2919_v6 }
0x1132   :  { %v988_v3 = vpop.f32.mrf.mxu0 }
0x1133   :  { %v989_v4 = vadd.f32 %v3095_v23, %v988_v3 }
0x1134   :  { %v2646_v8 = vpop.f32.mrf.mxu0 }
0x1135   :  { %v993_v11 = vrot.slane %v989_v4, 4 }
0x1137   :  { %1002 = vrot.lane.b32.xlu0 %v993_v11, %s2921_s3  ;;  %v995_v12 = vadd.f32 %v993_v11, %v3128_v39 }
0x1139   :  { %v2415_v13 = vmul.f32 -1.442695, %v995_v12 }
0x113b   :  { %2826 = vpow2.f32 %v2415_v13 }
0x1148   :  { %v2827_v14 = vpop.eup %2826 }
0x1149   :  { %v999_v15 = vadd.f32 1.0, %v2827_v14 }
0x114b   :  { %2828 = vrcp.f32 %v999_v15 }
0x1158   :  { %v2829_v16 = vpop.eup %2828 }
0x1159   :  { %v1012_v22 = vsub.f32 1.0, %v2829_v16  ;;  %v1020_v25 = vmul.f32 %v2829_v16, %v1018_v21 }
0x11a9   :  { %v1003_v17 = vpop.permute.xlu0 %1002 }
0x11aa   :  { %v1005_v41 = vmul.f32 %v2829_v16, %v1003_v17 }
0x11ac   :  { %1007 = vrot.lane.b32.xlu1 %v1005_v41, %s2921_s3 }
0x121e   :  { %v1008_v18 = vpop.permute.xlu1 %1007 }
0x121f   :  { %v1010_v19 = vadd.f32 %v1008_v18, %v3128_v39 }
0x1221   :  { %2830 = vtanh.f32 %v1010_v19 }
0x122e   :  { %v2831_v20 = vpop.eup %2830 }
0x122f   :  { %1014 = vrot.lane.b32.xlu0 %v2831_v20, %s2922_s6 }
0x12a1   :  { %v1015_v24 = vpop.permute.xlu0 %1014 }
0x12a2   :  { %v1017_v26 = vmul.f32 %v1015_v24, %v1012_v22 }
0x12a4   :  { %v1021_v27 = vadd.f32 %v1020_v25, %v1017_v26 }
0x12a6   :  { %v1023_v28 = vrot.slane %v1021_v27, 4  ;;  %v1124_v51 = vrot.slane %v1021_v27, 6 }
0x12a8   :  { %1024 = vrot.lane.b32.xlu1 %v1023_v28, %s2922_s6 }
0x131a   :  { %v1025_v29 = vpop.permute.xlu1 %1024 }
0x131b   :  { %2656 = vmatmul.mubr.msk.f32.vlgmr.msra.gmra.mxu1 %vm291_vm4, %v1025_v29 }
0x131c   :  { %2670 = vmatpush3.msra.mxu1 %v3037_v5  ;;  %2677 = vmatprep.mubr.msk.f32.mxu1 %vm2920_vm2, %v2919_v6 }
0x131d   :  { %2671 = vmatprep.subr.mxu1 %v2919_v6 }
0x131e   :  { %2672 = vmatpush3.msra.mxu1 %v3044_v7 }
0x131f   :  { %2673 = vmatprep.subr.mxu1 %v2919_v6 }
0x1320   :  { %2674 = vmatpush3.msra.mxu1 %v3055_v9 }
0x1321   :  { %2675 = vmatprep.subr.mxu1 %v2919_v6 }
0x1322   :  { %2676 = vmatpush3.msra.mxu1 %v3063_v10 }
0x1323   :  { %2691 = vmatprep.subr.mxu1 %v2919_v6 }
0x13db   :  { %v1094_v30 = vpop.f32.mrf.mxu1 }
0x13dc   :  { %v1095_v31 = vadd.f32 %v3095_v23, %v1094_v30 }
0x13dd   :  { %v2657_v33 = vpop.f32.mrf.mxu1 }
0x13de   :  { %v1099_v34 = vrot.slane %v1095_v31, 2 }
0x13e0   :  { %1108 = vrot.lane.b32.xlu0 %v1099_v34, %s2921_s3  ;;  %v1101_v38 = vadd.f32 %v1099_v34, %v3128_v39 }
0x13e2   :  { %v2417_v40 = vmul.f32 -1.442695, %v1101_v38 }
0x13e4   :  { %2832 = vpow2.f32 %v2417_v40 }
0x13f1   :  { %v2833_v42 = vpop.eup %2832 }
0x13f2   :  { %v1105_v43 = vadd.f32 1.0, %v2833_v42 }
0x13f4   :  { %2834 = vrcp.f32 %v1105_v43 }
0x1401   :  { %v2835_v45 = vpop.eup %2834 }
0x1402   :  { %v1118_v52 = vsub.f32 1.0, %v2835_v45  ;;  %v1126_v54 = vmul.f32 %v2835_v45, %v1124_v51 }
0x1452   :  { %v1109_v46 = vpop.permute.xlu0 %1108 }
0x1453   :  { %v1111_v47 = vmul.f32 %v2835_v45, %v1109_v46 }
0x1455   :  { %1113 = vrot.lane.b32.xlu1 %v1111_v47, %s2921_s3 }
0x14c7   :  { %v1114_v48 = vpop.permute.xlu1 %1113 }
0x14c8   :  { %v1116_v49 = vadd.f32 %v1114_v48, %v3128_v39 }
0x14ca   :  { %2836 = vtanh.f32 %v1116_v49 }
0x14d7   :  { %v2837_v50 = vpop.eup %2836 }
0x14d8   :  { %1120 = vrot.lane.b32.xlu0 %v2837_v50, %s2922_s6 }
0x154a   :  { %v1121_v53 = vpop.permute.xlu0 %1120 }
0x154b   :  { %v1123_v55 = vmul.f32 %v1121_v53, %v1118_v52 }
0x154d   :  { %v1127_v56 = vadd.f32 %v1126_v54, %v1123_v55 }
0x154f   :  { %v1129_v57 = vrot.slane %v1127_v56, 6 }
0x1551   :  { %1130 = vrot.lane.b32.xlu1 %v1129_v57, %s2922_s6 }
0x15c3   :  { %v1131_v58 = vpop.permute.xlu1 %1130 }
0x15c4   :  { %2667 = vmatmul.mubr.msk.f32.vlgmr.msra.gmra.mxu0 %vm291_vm4, %v1131_v58 }
0x15c5   :  { %2681 = vmatpush3.msra.mxu0 %v3037_v5  ;;  %2688 = vmatprep.mubr.msk.f32.mxu0 %vm2920_vm2, %v2919_v6 }
0x15c6   :  { %2682 = vmatprep.subr.mxu0 %v2919_v6 }
0x15c7   :  { %2683 = vmatpush3.msra.mxu0 %v3044_v7 }
0x15c8   :  { %2684 = vmatprep.subr.mxu0 %v2919_v6 }
0x15c9   :  { %2685 = vmatpush3.msra.mxu0 %v3055_v9 }
0x15ca   :  { %2686 = vmatprep.subr.mxu0 %v2919_v6 }
0x15cb   :  { %2687 = vmatpush3.msra.mxu0 %v3063_v10 }
0x15cc   :  { %2702 = vmatprep.subr.mxu0 %v2919_v6 }
0x1684   :  { %v1200_v39 = vpop.f32.mrf.mxu0 }
0x1685   :  { %v1201_v59 = vadd.f32 %v3095_v23, %v1200_v39 }
0x1686   :  { %v2668_v61 = vpop.f32.mrf.mxu0 }
0x1687   :  { %1212 = vrot.lane.b32.xlu0 %v1201_v59, %s2921_s3  ;;  %v1204_v63 = vadd.f32 %v1201_v59, %v3284_v62 }
0x1689   :  { %v2419_v0 = vmul.f32 -1.442695, %v1204_v63 }
0x168b   :  { %2838 = vpow2.f32 %v2419_v0 }
0x1698   :  { %v2839_v1 = vpop.eup %2838 }
0x1699   :  { %v1208_v2 = vadd.f32 1.0, %v2839_v1 }
0x169b   :  { %2840 = vrcp.f32 %v1208_v2 }
0x16a8   :  { %v2841_v3 = vpop.eup %2840 }
0x16a9   :  { %v1222_v37 = vsub.f32 1.0, %v2841_v3  ;;  %v1229_v14 = vmul.f32 %v2841_v3, %v1129_v57 }
0x16f9   :  { %v1213_v4 = vpop.permute.xlu0 %1212 }
0x16fa   :  { %v1215_v8 = vmul.f32 %v2841_v3, %v1213_v4 }
0x16fc   :  { %1217 = vrot.lane.b32.xlu1 %v1215_v8, %s2921_s3 }
0x176e   :  { %v1218_v11 = vpop.permute.xlu1 %1217 }
0x176f   :  { %v1220_v12 = vadd.f32 %v1218_v11, %v3284_v62 }
0x1771   :  { %2842 = vtanh.f32 %v1220_v12 }
0x177e   :  { %v2843_v13 = vpop.eup %2842 }
0x177f   :  { %1224 = vrot.lane.b32.xlu0 %v2843_v13, %s2922_s6 }
0x17f1   :  { %v1225_v60 = vpop.permute.xlu0 %1224 }
0x17f2   :  { %v1227_v15 = vmul.f32 %v1225_v60, %v1222_v37 }
0x17f4   :  { %v1230_v16 = vadd.f32 %v1229_v14, %v1227_v15 }
0x17f6   :  { %1232 = vrot.lane.b32.xlu1 %v1230_v16, %s2922_s6  ;;  %v1332_v33 = vrot.slane %v1230_v16, 6 }
0x1868   :  { %v1233_v17 = vpop.permute.xlu1 %1232 }
0x1869   :  { %2678 = vmatmul.mubr.msk.f32.vlgmr.msra.gmra.mxu1 %vm291_vm4, %v1233_v17 }
0x186a   :  { %2692 = vmatpush3.msra.mxu1 %v3037_v5  ;;  %2699 = vmatprep.mubr.msk.f32.mxu1 %vm2920_vm2, %v2919_v6 }
0x186b   :  { %2693 = vmatprep.subr.mxu1 %v2919_v6 }
0x186c   :  { %2694 = vmatpush3.msra.mxu1 %v3044_v7 }
0x186d   :  { %2695 = vmatprep.subr.mxu1 %v2919_v6 }
0x186e   :  { %2696 = vmatpush3.msra.mxu1 %v3055_v9 }
0x186f   :  { %2697 = vmatprep.subr.mxu1 %v2919_v6 }
0x1870   :  { %2698 = vmatpush3.msra.mxu1 %v3063_v10 }
0x1871   :  { %2713 = vmatprep.subr.mxu1 %v2919_v6 }
0x1929   :  { %v1302_v41 = vpop.f32.mrf.mxu1 }
0x192a   :  { %v1303_v18 = vadd.f32 %v3095_v23, %v1302_v41 }
0x192b   :  { %v2679_v19 = vpop.f32.mrf.mxu1 }
0x192c   :  { %v1307_v20 = vrot.slane %v1303_v18, 6 }
0x192e   :  { %1316 = vrot.lane.b32.xlu0 %v1307_v20, %s2921_s3  ;;  %v1309_v21 = vadd.f32 %v1307_v20, %v3284_v62 }
0x1930   :  { %v2421_v22 = vmul.f32 -1.442695, %v1309_v21 }
0x1932   :  { %2844 = vpow2.f32 %v2421_v22 }
0x193f   :  { %v2845_v24 = vpop.eup %2844 }
0x1940   :  { %v1313_v25 = vadd.f32 1.0, %v2845_v24 }
0x1942   :  { %2846 = vrcp.f32 %v1313_v25 }
0x194f   :  { %v2847_v26 = vpop.eup %2846 }
0x1950   :  { %v1326_v34 = vsub.f32 1.0, %v2847_v26  ;;  %v1334_v42 = vmul.f32 %v2847_v26, %v1332_v33 }
0x19a0   :  { %v1317_v27 = vpop.permute.xlu0 %1316 }
0x19a1   :  { %v1319_v28 = vmul.f32 %v2847_v26, %v1317_v27  ;;  %v1757_v26 = vld [vmem:[%s3500_s8 + $0x8] sm:$0xff] }
0x19a3   :  { %1321 = vrot.lane.b32.xlu1 %v1319_v28, %s2921_s3 }
0x1a15   :  { %v1322_v29 = vpop.permute.xlu1 %1321 }
0x1a16   :  { %v1324_v30 = vadd.f32 %v1322_v29, %v3284_v62 }
0x1a18   :  { %2848 = vtanh.f32 %v1324_v30 }
0x1a25   :  { %v2849_v31 = vpop.eup %2848 }
0x1a26   :  { %1328 = vrot.lane.b32.xlu0 %v2849_v31, %s2922_s6 }
0x1a98   :  { %v1329_v38 = vpop.permute.xlu0 %1328 }
0x1a99   :  { %v1331_v40 = vmul.f32 %v1329_v38, %v1326_v34 }
0x1a9b   :  { %v1335_v43 = vadd.f32 %v1334_v42, %v1331_v40 }
0x1a9d   :  { %v1337_v45 = vrot.slane %v1335_v43, 2  ;;  %v1438_v61 = vrot.slane %v1335_v43, 6 }
0x1a9f   :  { %1338 = vrot.lane.b32.xlu1 %v1337_v45, %s2922_s6 }
0x1b11   :  { %v1339_v46 = vpop.permute.xlu1 %1338 }
0x1b12   :  { %2689 = vmatmul.mubr.msk.f32.vlgmr.msra.gmra.mxu0 %vm291_vm4, %v1339_v46 }
0x1b13   :  { %2703 = vmatpush3.msra.mxu0 %v3037_v5  ;;  %2710 = vmatprep.mubr.msk.f32.mxu0 %vm2920_vm2, %v2919_v6 }
0x1b14   :  { %2704 = vmatprep.subr.mxu0 %v2919_v6 }
0x1b15   :  { %2705 = vmatpush3.msra.mxu0 %v3044_v7 }
0x1b16   :  { %2706 = vmatprep.subr.mxu0 %v2919_v6 }
0x1b17   :  { %2707 = vmatpush3.msra.mxu0 %v3055_v9 }
0x1b18   :  { %2708 = vmatprep.subr.mxu0 %v2919_v6 }
0x1b19   :  { %2709 = vmatpush3.msra.mxu0 %v3063_v10 }
0x1b1a   :  { %2724 = vmatprep.subr.mxu0 %v2919_v6 }
0x1bd2   :  { %v1408_v47 = vpop.f32.mrf.mxu0 }
0x1bd3   :  { %v1409_v48 = vadd.f32 %v3095_v23, %v1408_v47 }
0x1bd4   :  { %v2690_v49 = vpop.f32.mrf.mxu0 }
0x1bd5   :  { %v1413_v50 = vrot.slane %v1409_v48, 4 }
0x1bd7   :  { %1422 = vrot.lane.b32.xlu0 %v1413_v50, %s2921_s3  ;;  %v1415_v51 = vadd.f32 %v1413_v50, %v3284_v62 }
0x1bd9   :  { %v2423_v52 = vmul.f32 -1.442695, %v1415_v51 }
0x1bdb   :  { %2850 = vpow2.f32 %v2423_v52 }
0x1be8   :  { %v2851_v53 = vpop.eup %2850 }
0x1be9   :  { %v1419_v54 = vadd.f32 1.0, %v2851_v53 }
0x1beb   :  { %2852 = vrcp.f32 %v1419_v54 }
0x1bf8   :  { %v2853_v55 = vpop.eup %2852 }
0x1bf9   :  { %v1432_v63 = vsub.f32 1.0, %v2853_v55  ;;  %v1440_v1 = vmul.f32 %v2853_v55, %v1438_v61 }
0x1c49   :  { %v1423_v56 = vpop.permute.xlu0 %1422 }
0x1c4a   :  { %v1425_v57 = vmul.f32 %v2853_v55, %v1423_v56 }
0x1c4c   :  { %1427 = vrot.lane.b32.xlu1 %v1425_v57, %s2921_s3 }
0x1cbe   :  { %v1428_v58 = vpop.permute.xlu1 %1427 }
0x1cbf   :  { %v1430_v39 = vadd.f32 %v1428_v58, %v3284_v62  ;;  %v1858_v58 = vld [vmem:[%s3501_s9] sm:$0xff] }
0x1cc1   :  { %2854 = vtanh.f32 %v1430_v39 }
0x1cce   :  { %v2855_v59 = vpop.eup %2854 }
0x1ccf   :  { %1434 = vrot.lane.b32.xlu0 %v2855_v59, %s2922_s6 }
0x1d41   :  { %v1435_v0 = vpop.permute.xlu0 %1434 }
0x1d42   :  { %v1437_v2 = vmul.f32 %v1435_v0, %v1432_v63  ;;  %v3399_v63 = vld [vmem:[%s3503_s11] ss:$0 sm:$0xff]  ;;  %s2925_s11 = smov 120  }
0x1d44   :  { %v1441_v3 = vadd.f32 %v1440_v1, %v1437_v2 }
0x1d46   :  { %v1443_v4 = vrot.slane %v1441_v3, 4  ;;  %v1544_v18 = vrot.slane %v1441_v3, 6 }
0x1d48   :  { %1444 = vrot.lane.b32.xlu1 %v1443_v4, %s2922_s6 }
0x1dba   :  { %v1445_v8 = vpop.permute.xlu1 %1444 }
0x1dbb   :  { %2700 = vmatmul.mubr.msk.f32.vlgmr.msra.gmra.mxu1 %vm291_vm4, %v1445_v8 }
0x1dbc   :  { %2714 = vmatpush3.msra.mxu1 %v3037_v5  ;;  %2721 = vmatprep.mubr.msk.f32.mxu1 %vm2920_vm2, %v2919_v6 }
0x1dbd   :  { %2715 = vmatprep.subr.mxu1 %v2919_v6 }
0x1dbe   :  { %2716 = vmatpush3.msra.mxu1 %v3044_v7 }
0x1dbf   :  { %2717 = vmatprep.subr.mxu1 %v2919_v6 }
0x1dc0   :  { %2718 = vmatpush3.msra.mxu1 %v3055_v9 }
0x1dc1   :  { %2719 = vmatprep.subr.mxu1 %v2919_v6 }
0x1dc2   :  { %2720 = vmatpush3.msra.mxu1 %v3063_v10 }
0x1dc3   :  { %2737 = vmatprep.subr.mxu1 %v2919_v6 }
0x1e7b   :  { %v1514_v11 = vpop.f32.mrf.mxu1 }
0x1e7c   :  { %v1515_v5 = vadd.f32 %v3095_v23, %v1514_v11 }
0x1e7d   :  { %v2701_v12 = vpop.f32.mrf.mxu1 }
0x1e7e   :  { %v1519_v13 = vrot.slane %v1515_v5, 2 }
0x1e80   :  { %1528 = vrot.lane.b32.xlu0 %v1519_v13, %s2921_s3  ;;  %v1521_v37 = vadd.f32 %v1519_v13, %v3284_v62 }
0x1e82   :  { %v2425_v7 = vmul.f32 -1.442695, %v1521_v37 }
0x1e84   :  { %2856 = vpow2.f32 %v2425_v7 }
0x1e91   :  { %v2857_v60 = vpop.eup %2856 }
0x1e92   :  { %v1525_v14 = vadd.f32 1.0, %v2857_v60 }
0x1e94   :  { %2858 = vrcp.f32 %v1525_v14 }
0x1ea1   :  { %v2859_v9 = vpop.eup %2858 }
0x1ea2   :  { %v1538_v19 = vsub.f32 1.0, %v2859_v9  ;;  %v1546_v21 = vmul.f32 %v2859_v9, %v1544_v18 }
0x1ef2   :  { %v1529_v15 = vpop.permute.xlu0 %1528 }
0x1ef3   :  { %v1531_v16 = vmul.f32 %v2859_v9, %v1529_v15 }
0x1ef5   :  { %1533 = vrot.lane.b32.xlu1 %v1531_v16, %s2921_s3 }
0x1f67   :  { %v1534_v10 = vpop.permute.xlu1 %1533 }
0x1f68   :  { %v1536_v17 = vadd.f32 %v1534_v10, %v3284_v62  ;;  %v1756_v62 = vld [vmem:[%s3500_s8] sm:$0xff] }
0x1f6a   :  { %2860 = vtanh.f32 %v1536_v17 }
0x1f77   :  { %v2861_v41 = vpop.eup %2860 }
0x1f78   :  { %1540 = vrot.lane.b32.xlu0 %v2861_v41, %s2922_s6 }
0x1fea   :  { %v1541_v20 = vpop.permute.xlu0 %1540 }
0x1feb   :  { %v1543_v22 = vmul.f32 %v1541_v20, %v1538_v19 }
0x1fed   :  { %v1547_v24 = vadd.f32 %v1546_v21, %v1543_v22 }
0x1fef   :  { %v1549_v25 = vrot.slane %v1547_v24, 6 }
0x1ff1   :  { %1550 = vrot.lane.b32.xlu1 %v1549_v25, %s2922_s6 }
0x2063   :  { %v1551_v27 = vpop.permute.xlu1 %1550 }
0x2064   :  { %2711 = vmatmul.mubr.msk.f32.vlgmr.msra.gmra.mxu0 %vm291_vm4, %v1551_v27 }
0x2065   :  { %2725 = vmatpush3.msra.mxu0 %v1757_v26  ;;  %2728 = vmatprep.mubr.msk.f32.mxu0 %vm2920_vm2, %v2919_v6 }
0x2066   :  { %2726 = vmatprep.subr.mxu0 %v2919_v6 }
0x2067   :  { %2727 = vmatpush3.msra.mxu0 %v1756_v62 }
0x2068   :  { %2729 = vmatmul.mubr.msk.f32.vlgmr.msra.gmra.mxu0 %vm182_vm3, %v3102_v32  ;;  %2752 = vmatprep.subr.mxu0 %v2919_v6 }
0x2069   :  { %2731 = vmatprep.mubr.msk.f32.mxu0 %vm2920_vm2, %v2919_v6 }
0x206c   :  { %2732 = vmatmul.mubr.msk.f32.gmra.mxu0 %vm182_vm3, %v3112_v35  ;;  %v2430_v35 = vld [vmem:[%s3502_s10] ss:$0 sm:$0xff] }
0x206d   :  { %2734 = vmatprep.mubr.msk.f32.mxu0 %vm2920_vm2, %v2919_v6 }
0x2070   :  { %2735 = vmatmul.mubr.msk.f32.gmra.mxu0 %vm182_vm3, %v3115_v36 }
0x2071   :  { %2768 = vmatprep.mubr.msk.f32.mxu0 %vm2920_vm2, %v2919_v6 }
0x2124   :  { %v1620_v28 = vpop.f32.mrf.mxu0 }
0x2125   :  { %v1621_v32 = vadd.f32 %v3095_v23, %v1620_v28 }
0x2126   :  { %v2712_v29 = vpop.f32.mrf.mxu0 }
0x2127   :  { %1632 = vrot.lane.b32.xlu0 %v1621_v32, %s2921_s3  ;;  %v1624_v43 = vadd.f32 %v1621_v32, %v3135_v44 }
0x2128   :  { %v1844_v30 = vpop.f32.mrf.mxu0 }
0x2129   :  { %v2427_v23 = vmul.f32 -1.442695, %v1624_v43  ;;  %v1845_v3 = vadd.f32 %v2430_v35, %v1844_v30 }
0x212a   :  { %v2730_v31 = vpop.f32.mrf.mxu0 }
0x212b   :  { %2862 = vpow2.f32 %v2427_v23 }
0x212c   :  { %v1849_v33 = vpop.f32.mrf.mxu0 }
0x212d   :  { %v3373_v34 = vadd.f32 %v2430_v35, %v1849_v33 }
0x212e   :  { %v2733_v38 = vpop.f32.mrf.mxu0 }
0x212f   :  { %v2896_v38 = vld [vmem:[%s3499_s7] ss:$0 sm:$0xff] }
0x2130   :  { %v1854_v36 = vpop.f32.mrf.mxu0 }
0x2131   :  { %v3375_v40 = vadd.f32 %v2430_v35, %v1854_v36 }
0x2132   :  { %v2736_v42 = vpop.f32.mrf.mxu0 }
0x2138   :  { %v2863_v45 = vpop.eup %2862 }
0x2139   :  { %v1628_v46 = vadd.f32 1.0, %v2863_v45 }
0x213b   :  { %2864 = vrcp.f32 %v1628_v46 }
0x2148   :  { %v2865_v47 = vpop.eup %2864 }
0x2149   :  { %v1642_v53 = vsub.f32 1.0, %v2865_v47  ;;  %v1649_v55 = vmul.f32 %v2865_v47, %v1549_v25 }
0x2199   :  { %v1633_v48 = vpop.permute.xlu0 %1632 }
0x219a   :  { %v1635_v49 = vmul.f32 %v2865_v47, %v1633_v48 }
0x219c   :  { %1637 = vrot.lane.b32.xlu1 %v1635_v49, %s2921_s3 }
0x220e   :  { %v1638_v50 = vpop.permute.xlu1 %1637 }
0x220f   :  { %v1640_v51 = vadd.f32 %v1638_v50, %v3135_v44 }
0x2211   :  { %2866 = vtanh.f32 %v1640_v51 }
0x221e   :  { %v2867_v52 = vpop.eup %2866 }
0x221f   :  { %1644 = vrot.lane.b32.xlu0 %v2867_v52, %s2922_s6 }
0x2291   :  { %v1645_v54 = vpop.permute.xlu0 %1644 }
0x2292   :  { %v1647_v56 = vmul.f32 %v1645_v54, %v1642_v53 }
0x2294   :  { %v3381_v57 = vadd.f32 %v1649_v55, %v1647_v56 }
0x2296   :  { %1652 = vrot.lane.b32.xlu1 %v3381_v57, %s2922_s6 }
0x2308   :  { %v1653_v39 = vpop.permute.xlu1 %1652 }
0x2309   :  { %2722 = vmatmul.mubr.msk.f32.vlgmr.msra.gmra.mxu1 %vm291_vm4, %v1653_v39 }
0x230a   :  { %2738 = vmatpush3.msra.mxu1 %v1858_v58  ;;  %2739 = vmatprep.mubr.msk.f32.mxu1 %vm2920_vm2, %v2919_v6 }
0x230b   :  { %2742 = vmatprep.subr.mxu1 %v2919_v6 }
0x230d   :  { %2740 = vmatmul.mubr.f32.vlgmr.msra.gmra.mxu1 %v2919_v6 }
0x230e   :  { %2743 = vmatpush3.msra.mxu1 %v1858_v58  ;;  %2744 = vmatprep.mubr.msk.f32.mxu1 %vm2920_vm2, %v2919_v6 }
0x230f   :  { %2747 = vmatprep.subr.mxu1 %v2919_v6 }
0x23c9   :  { %v1722_v59 = vpop.f32.mrf.mxu1 }
0x23ca   :  { %v1723_v36 = vadd.f32 %v2896_v38, %v1722_v59 }
0x23cb   :  { %v2723_v61 = vpop.f32.mrf.mxu1 }
0x23cc   :  { %v1727_v43 = vrot.slane %v1723_v36, 6  ;;  %v2440_v36 = vld [vmem:[%s3505_s13] ss:$0 sm:$0xff]  ;;  %s2897_s13 = scalar_lea.vmem %s2384_s30, 32 }
0x23cd   :  { %v1935_v0 = vpop.f32.mrf.mxu1  ;;  %p2898_p0 = scmp.ne.s32.totalorder %s2384_s30, %s2897_s13  ;;  %p2903_p2 = scmp.lt.s32.totalorder %s2897_s13, %s2897_s13 }
0x23ce   :  { %v1936_v1 = vadd.f32 %v3399_v63, %v1935_v0 }
0x23cf   :  { %v2741_v2 = vpop.f32.mrf.mxu1  ;;  %p2904_p3 = por %p2903_p2, %p2902_p1 }
0x23d0   :  { %1947 = vrot.lane.b32.xlu0 %v1936_v1, %s2923_s25  ;;  %v1939_v4 = vadd.f32 %v1936_v1, %v1845_v3 }
0x23d1   :  { %p2905_p4 = pnand %p2904_p3, %p2898_p0 }
0x23d2   :  { %v2435_v8 = vmul.f32 -1.442695, %v1939_v4 }
0x23d4   :  { %2868 = vpow2.f32 %v2435_v8  ;;  %v2201_v8 = vld [vmem:[%s3504_s12 + $0x38] sm:$0xff] }
0x23d5   :  { %2753 = vmatpush3.msra.mxu0 %v2201_v8 }
0x23d6   :  { %2754 = vmatprep.subr.mxu0 %v2919_v6 }
0x23e1   :  { %v2869_v11 = vpop.eup %2868 }
0x23e2   :  { %v1943_v5 = vadd.f32 1.0, %v2869_v11  ;;  %v2200_v11 = vld [vmem:[%s3504_s12 + $0x30] sm:$0xff] }
0x23e3   :  { %2755 = vmatpush3.msra.mxu0 %v2200_v11 }
0x23e4   :  { %2870 = vrcp.f32 %v1943_v5  ;;  %v1752_v5 = vrot.slane %v3381_v57, 6  ;;  %2756 = vmatprep.subr.mxu0 %v2919_v6  ;;  %v2198_v57 = vld [vmem:[%s3504_s12 + $0x20] sm:$0xff] }
0x23f1   :  { %v2871_v12 = vpop.eup %2870 }
0x23f2   :  { %v1957_v9 = vsub.f32 1.0, %v2871_v12  ;;  %v1963_v16 = vmul.f32 0.0, %v2871_v12 }
0x2442   :  { %v1948_v13 = vpop.permute.xlu0 %1947 }
0x2443   :  { %v1950_v37 = vmul.f32 %v2871_v12, %v1948_v13 }
0x2445   :  { %1952 = vrot.lane.b32.xlu1 %v1950_v37, %s2924_s5 }
0x24b7   :  { %v1953_v7 = vpop.permute.xlu1 %1952 }
0x24b8   :  { %v1955_v60 = vadd.f32 %v1953_v7, %v1845_v3 }
0x24ba   :  { %2872 = vtanh.f32 %v1955_v60  ;;  %v2197_v60 = vld [vmem:[%s3504_s12 + $0x18] sm:$0xff] }
0x24c7   :  { %v2873_v14 = vpop.eup %2872 }
0x24c8   :  { %1959 = vrot.lane.b32.xlu0 %v2873_v14, %s2925_s11  ;;  %v2196_v14 = vld [vmem:[%s3504_s12 + $0x10] sm:$0xff] }
0x253a   :  { %v1960_v15 = vpop.permute.xlu0 %1959 }
0x253b   :  { %v1962_v10 = vmul.f32 %v1960_v15, %v1957_v9  ;;  %v2195_v9 = vld [vmem:[%s3504_s12 + $0x8] sm:$0xff] }
0x253c   :  { %v2286_v15 = vld [vmem:[%s3506_s14 + $0x8] sm:$0xff] }
0x253d   :  { %v1964_v17 = vadd.f32 %v1963_v16, %v1962_v10 }
0x253f   :  { %1966 = vrot.lane.b32.xlu1 %v1964_v17, %s2925_s11 }
0x25b1   :  { %v1967_v41 = vpop.permute.xlu1 %1966 }
0x25b2   :  { %2745 = vmatmul.mubr.msk.f32.vlgmr.msra.gmra.mxu1 %vm1866_vm5, %v1967_v41  ;;  %v2285_v41 = vld [vmem:[%s3506_s14] sm:$0xff]  ;;  %s2929_s14 = smov 40  }
0x25b3   :  { %2748 = vmatpush3.msra.mxu1 %v1858_v58  ;;  %2749 = vmatprep.mubr.msk.f32.mxu1 %vm2920_vm2, %v2919_v6 }
0x25b4   :  { %2771 = vmatprep.subr.mxu1 %v2919_v6 }
0x2672   :  { %v2036_v18 = vpop.f32.mrf.mxu1 }
0x2673   :  { %v2037_v19 = vadd.f32 %v3399_v63, %v2036_v18 }
0x2674   :  { %v2746_v20 = vpop.f32.mrf.mxu1 }
0x2675   :  { %2048 = vrot.lane.b32.xlu0 %v2037_v19, %s2923_s25  ;;  %v2040_v21 = vadd.f32 %v2037_v19, %v3373_v34  ;;  %v2284_v20 = vld [vmem:[%s3493_s1] sm:$0x3] }
0x2677   :  { %v2437_v22 = vmul.f32 -1.442695, %v2040_v21 }
0x2679   :  { %2874 = vpow2.f32 %v2437_v22 }
0x2686   :  { %v2875_v24 = vpop.eup %2874 }
0x2687   :  { %v2044_v25 = vadd.f32 1.0, %v2875_v24 }
0x2689   :  { %2876 = vrcp.f32 %v2044_v25 }
0x2696   :  { %v2877_v26 = vpop.eup %2876 }
0x2697   :  { %v2058_v30 = vsub.f32 1.0, %v2877_v26  ;;  %v2064_v35 = vmul.f32 %v2877_v26, %v1964_v17  ;;  %v2194_v17 = vld [vmem:[%s3504_s12] sm:$0xff] }
0x26e7   :  { %v2049_v27 = vpop.permute.xlu0 %2048 }
0x26e8   :  { %v2051_v62 = vmul.f32 %v2877_v26, %v2049_v27 }
0x26ea   :  { %2053 = vrot.lane.b32.xlu1 %v2051_v62, %s2924_s5 }
0x275c   :  { %v2054_v28 = vpop.permute.xlu1 %2053 }
0x275d   :  { %v2056_v32 = vadd.f32 %v2054_v28, %v3373_v34  ;;  %v1729_v34 = vadd.f32 %v1727_v43, %v3135_v44 }
0x275f   :  { %2878 = vtanh.f32 %v2056_v32  ;;  %v2429_v23 = vmul.f32 -1.442695, %v1729_v34  ;;  %v2443_v34 = vld [vmem:[%s3507_s15] ss:$0 sm:$0xff] }
0x2761   :  { %2880 = vpow2.f32 %v2429_v23 }
0x276c   :  { %v2879_v29 = vpop.eup %2878 }
0x276d   :  { %2060 = vrot.lane.b32.xlu0 %v2879_v29, %s2925_s11 }
0x276e   :  { %v2881_v45 = vpop.eup %2880 }
0x276f   :  { %v1733_v46 = vadd.f32 1.0, %v2881_v45 }
0x2771   :  { %2882 = vrcp.f32 %v1733_v46 }
0x277e   :  { %v2883_v48 = vpop.eup %2882 }
0x277f   :  { %v1746_v4 = vsub.f32 1.0, %v2883_v48  ;;  %v1754_v37 = vmul.f32 %v2883_v48, %v1752_v5 }
0x27df   :  { %v2061_v31 = vpop.permute.xlu0 %2060 }
0x27e0   :  { %v2063_v33 = vmul.f32 %v2061_v31, %v2058_v30 }
0x27e2   :  { %v3419_v42 = vadd.f32 %v2064_v35, %v2063_v33 }
0x27e4   :  { %2067 = vrot.lane.b32.xlu1 %v3419_v42, %s2925_s11 }
0x27e8   :  { %1736 = vrot.lane.b32.xlu1 %v1727_v43, %s2921_s3 }
0x2856   :  { %v2068_v47 = vpop.permute.xlu1 %2067 }
0x2857   :  { %2750 = vmatmul.mubr.msk.f32.vlgmr.msra.gmra.mxu1 %vm1866_vm5, %v2068_v47 }
0x2858   :  { %2775 = vmatprep.mubr.msk.f32.mxu1 %vm2920_vm2, %v2919_v6  ;;  %2772 = vmatpush3.msra.mxu1 %v2286_v15 }
0x2859   :  { %2773 = vmatprep.subr.mxu1 %v2919_v6 }
0x285a   :  { %v1737_v49 = vpop.permute.xlu1 %1736  ;;  %2774 = vmatpush3.msra.mxu1 %v2285_v41 }
0x285b   :  { %v1739_v50 = vmul.f32 %v2883_v48, %v1737_v49  ;;  %2776 = vmatmul.mubr.msk.f32.vlgmr.msra.gmra.mxu1 %vm182_vm3, %v2284_v20 }
0x285d   :  { %1741 = vrot.lane.b32.xlu1 %v1739_v50, %s2921_s3 }
0x28cf   :  { %v1742_v51 = vpop.permute.xlu1 %1741 }
0x28d0   :  { %v1744_v52 = vadd.f32 %v1742_v51, %v3135_v44 }
0x28d2   :  { %2884 = vtanh.f32 %v1744_v52 }
0x28df   :  { %v2885_v53 = vpop.eup %2884 }
0x28e0   :  { %1748 = vrot.lane.b32.xlu1 %v2885_v53, %s2922_s6 }
0x2917   :  { %v2137_v54 = vpop.f32.mrf.mxu1 }
0x2918   :  { %v2138_v55 = vadd.f32 %v3399_v63, %v2137_v54 }
0x2919   :  { %v2751_v56 = vpop.f32.mrf.mxu1 }
0x291a   :  { %2149 = vrot.lane.b32.xlu0 %v2138_v55, %s2923_s25  ;;  %v2141_v58 = vadd.f32 %v2138_v55, %v3375_v40 }
0x291b   :  { %v2356_v33 = vpop.f32.mrf.mxu1 }
0x291c   :  { %v2439_v39 = vmul.f32 -1.442695, %v2141_v58 }
0x291d   :  { %v2777_v38 = vpop.f32.mrf.mxu1 }
0x291e   :  { %2886 = vpow2.f32 %v2439_v39 }
0x292b   :  { %v2887_v59 = vpop.eup %2886 }
0x292c   :  { %v2145_v61 = vadd.f32 1.0, %v2887_v59 }
0x292e   :  { %2888 = vrcp.f32 %v2145_v61 }
0x293b   :  { %v2889_v0 = vpop.eup %2888 }
0x293c   :  { %v2159_v16 = vsub.f32 1.0, %v2889_v0  ;;  %v2165_v18 = vmul.f32 %v2889_v0, %v3419_v42 }
0x2952   :  { %v1749_v63 = vpop.permute.xlu1 %1748 }
0x2953   :  { %v1751_v12 = vmul.f32 %v1749_v63, %v1746_v4 }
0x2955   :  { %v1755_v7 = vadd.f32 %v1754_v37, %v1751_v12 }
0x298c   :  { %v2150_v1 = vpop.permute.xlu0 %2149 }
0x298d   :  { %v2152_v44 = vmul.f32 %v2889_v0, %v2150_v1 }
0x298f   :  { %2154 = vrot.lane.b32.xlu0 %v2152_v44, %s2924_s5 }
0x2a01   :  { %v2155_v2 = vpop.permute.xlu0 %2154 }
0x2a02   :  { %v2157_v3 = vadd.f32 %v2155_v2, %v3375_v40  ;;  %v2199_v40 = vld [vmem:[%s3504_s12 + $0x28] sm:$0xff]  ;;  %s2927_s12 = smov 24  }
0x2a03   :  { %2757 = vmatpush3.msra.mxu0 %v2199_v40 }
0x2a04   :  { %2890 = vtanh.f32 %v2157_v3  ;;  %2758 = vmatprep.subr.mxu0 %v2919_v6 }
0x2a05   :  { %2759 = vmatpush3.msra.mxu0 %v2198_v57 }
0x2a06   :  { %2760 = vmatprep.subr.mxu0 %v2919_v6 }
0x2a07   :  { %2761 = vmatpush3.msra.mxu0 %v2197_v60 }
0x2a08   :  { %2762 = vmatprep.subr.mxu0 %v2919_v6 }
0x2a09   :  { %2763 = vmatpush3.msra.mxu0 %v2196_v14 }
0x2a0a   :  { %2764 = vmatprep.subr.mxu0 %v2919_v6 }
0x2a0b   :  { %2765 = vmatpush3.msra.mxu0 %v2195_v9 }
0x2a0c   :  { %2766 = vmatprep.subr.mxu0 %v2919_v6 }
0x2a0d   :  { %2767 = vmatpush3.msra.mxu0 %v2194_v17 }
0x2a11   :  { %v2891_v13 = vpop.eup %2890 }
0x2a12   :  { %2161 = vrot.lane.b32.xlu0 %v2891_v13, %s2925_s11  ;;  %s2926_s11 = smov 32  }
0x2a16   :  { %2168 = vrot.lane.b32.xlu0 %v1755_v7, %s2922_s6 }
0x2a84   :  { %v2162_v10 = vpop.permute.xlu0 %2161 }
0x2a85   :  { %v2164_v19 = vmul.f32 %v2162_v10, %v2159_v16 }
0x2a87   :  { %v2166_v6 = vadd.f32 %v2165_v18, %v2164_v19 }
0x2a88   :  { %v2169_v25 = vpop.permute.xlu0 %2168 }
0x2a89   :  { %2176 = vrot.lane.b32.xlu0 %v2166_v6, %s2926_s11  ;;  %v2172_v21 = vrot.slane %v2166_v6, 6  ;;  %v2183_v22 = vrot.slane %v2166_v6, 4  ;;  %v2179_v24 = vrot.slane %v2166_v6, 2 }
0x2a8b   :  { %2173 = vrot.lane.b32.xlu1 %v2172_v21, %s2927_s12 }
0x2a8d   :  { %2184 = vrot.lane.b32.xlu0 %v2183_v22, %s2928_s26 }
0x2a8f   :  { %2180 = vrot.lane.b32.xlu1 %v2179_v24, %s2929_s14 }
0x2afb   :  { %v2177_v26 = vpop.permute.xlu0 %2176 }
0x2afd   :  { %v2174_v27 = vpop.permute.xlu1 %2173 }
0x2afe   :  { %v2187_v62 = vsel %vm291_vm4, %v2169_v25, %v2174_v27 }
0x2aff   :  { %v2189_v32 = vsel %vm2188_vm6, %v2187_v62, %v2177_v26  ;;  %v2185_v29 = vpop.permute.xlu0 %2184 }
0x2b01   :  { %v2181_v28 = vpop.permute.xlu1 %2180 }
0x2b02   :  { %v2191_v30 = vsel %vm2190_vm7, %v2189_v32, %v2181_v28 }
0x2b03   :  { %v2193_v31 = vsel %vm2192_vm8, %v2191_v30, %v2185_v29 }
0x2b04   :  { %v2210_v35 = vrot.slane %v2193_v31, 2 }
0x2b06   :  { %2769 = vmatmul.mubr.msk.f32.vlgmr.msra.gmra.mxu0 %vm2211_vm9, %v2210_v35 }
0x2bc6   :  { %v2280_v42 = vpop.f32.mrf.mxu0 }
0x2bc7   :  { %v2281_v43 = vadd.f32 %v2440_v36, %v2280_v42 }
0x2bc8   :  { %v2770_v23 = vpop.f32.mrf.mxu0 }
0x2bc9   :  { %v2360_v45 = vadd.f32 %v2356_v33, %v2281_v43 }
0x2bcb   :  { %v2368_v46 = vadd.f32 %v2443_v34, %v2360_v45 }
0x2bcd   :  { %v2444_v47 = vmul.f32 -1.442695, %v2368_v46 }
0x2bcf   :  { %2892 = vpow2.f32 %v2444_v47 }
0x2bdc   :  { %v2893_v48 = vpop.eup %2892 }
0x2bdd   :  { %v2372_v49 = vadd.f32 1.0, %v2893_v48 }
0x2bdf   :  { %2894 = vrcp.f32 %v2372_v49 }
0x2bec   :  { %v2895_v50 = vpop.eup %2894 }
0x2bed   :  { %2376 = vst.msk [vmem:[#allocation2] sm:$0x3] %vm2375_vm10, %v2895_v50 }
0x2bee   :  { %2908 = shalt.err (!%p2905_p4)
}
0x2bef   :  { %2386 = dma.vmem_to_hbm [thread:$0]  %s2384_s30, 32, %s3508_s16, [#allocation3]  }
0x2bf0   :  { %2917 = dma.done.wait [#allocation3], 32  }
0x2bf1   :  { %2918 = vsyncadd [#allocation3], 4294967264 }
0x2bf2   :  { %2390 = vsyncpa [#allocation3], 1 }

</bundles_post_ra>
